<compile_context>
chip_gen: v5e
topology: v5e:2x2
jax: 0.10.0
libtpu: 0.0.40
codegen_flags: <defaults>
</compile_context>

<pallas_src>
import functools
import math

import jax
import jax.numpy as jnp
from jax.experimental import pallas as pl
from jax.experimental.pallas import tpu as pltpu

_HIGH = jax.lax.Precision.HIGHEST
_LOG_SQRT_2PI = 0.5 * math.log(2.0 * math.pi)


def _actor_kernel(obs_ref, hx_ref, cx_ref, eps_ref,
                  wb_ref, bb_ref,
                  wih_ref, bg_ref, whh_ref,
                  wh_ref, bh_ref,
                  out_ref, *, seq_len):
    S = seq_len
    B, H = hx_ref.shape
    A = eps_ref.shape[-1]

    # --- body: Linear(F -> H) + ReLU over all S*B rows -----------------------
    x = jnp.maximum(
        jnp.dot(obs_ref[...], wb_ref[...], precision=_HIGH,
                preferred_element_type=jnp.float32) + bb_ref[...], 0.0)

    # --- input projection hoisted out of the recurrence ----------------------
    # gates_in = x @ W_ih + (b_ih + b_hh)  -> one (S*B, 4H) matmul
    gates_in = jnp.dot(x, wih_ref[...], precision=_HIGH,
                       preferred_element_type=jnp.float32) + bg_ref[...]

    whh = whh_ref[...]            # (H, 4H)
    hx = hx_ref[...]              # (B, H)
    cx = cx_ref[...]              # (B, H)

    # --- LSTMCell, statically unrolled over S (PyTorch gate order i, f, g, o) -
    hs = []
    for i in range(S):                                    # static unroll
        gates = gates_in[i * B:(i + 1) * B, :] + jnp.dot(
            hx, whh, precision=_HIGH, preferred_element_type=jnp.float32)
        i_g = jax.nn.sigmoid(gates[:, 0 * H:1 * H])
        f_g = jax.nn.sigmoid(gates[:, 1 * H:2 * H])
        g_g = jnp.tanh(gates[:, 2 * H:3 * H])
        o_g = jax.nn.sigmoid(gates[:, 3 * H:4 * H])
        cx = f_g * cx + i_g * g_g
        hx = o_g * jnp.tanh(cx)
        hs.append(hx)

    h2 = jnp.concatenate(hs, axis=0)                      # (S*B, H), step-major

    # --- fused heads (mu | log_std) + tanh-squashed Normal sample / log-prob -
    heads = jnp.dot(h2, wh_ref[...], precision=_HIGH,
                    preferred_element_type=jnp.float32) + bh_ref[...]
    mu = heads[:, :A]
    log_std = jnp.clip(heads[:, A:], -20.0, 2.0)
    std = jnp.exp(log_std)

    eps = eps_ref[...]                                    # (S*B, A)
    x_t = mu + std * eps                                  # Normal.rsample()
    action = jnp.tanh(x_t)
    log_prob = (-((x_t - mu) ** 2) / (2.0 * std * std)
                - log_std - _LOG_SQRT_2PI)
    log_prob = log_prob - jnp.log(1.0 - action * action + 1e-7)

    out_ref[...] = jnp.concatenate([action, log_prob], axis=-1)   # (S*B, 2A)


def mlp_lstm_actor_forward(params, obs, lstm_hxs, eps):
    """obs: (B,S,F) f32, lstm_hxs=(hx,cx) each (B,H), eps: (B,S,A) ~ N(0,1)."""
    hx, cx = lstm_hxs
    B, S, F = obs.shape
    H = hx.shape[-1]
    A = params["w_mu"].shape[1]

    # step-major 2-D slabs so the kernel never reshapes 3-D refs
    obs_2d = jnp.swapaxes(obs, 0, 1).reshape(S * B, F)     # (S*B, F)
    eps_2d = jnp.swapaxes(eps, 0, 1).reshape(S * B, A)     # (S*B, A)

    # pre-fused parameters (cheap, done once per call in XLA)
    b_gates = params["b_ih"] + params["b_hh"]                       # (1, 4H)
    w_head = jnp.concatenate([params["w_mu"], params["w_ls"]], 1)   # (H, 2A)
    b_head = jnp.concatenate([params["b_mu"], params["b_ls"]], 1)   # (1, 2A)

    args = (obs_2d, hx, cx, eps_2d,
            params["w_body"], params["b_body"],
            params["w_ih"], b_gates, params["w_hh"],
            w_head, b_head)

    vmem = pl.BlockSpec(memory_space=pltpu.MemorySpace.VMEM)
    out = pl.pallas_call(
        functools.partial(_actor_kernel, seq_len=S),
        out_shape=jax.ShapeDtypeStruct((S * B, 2 * A), jnp.float32),
        in_specs=[vmem] * len(args),
        out_specs=vmem,
    )(*args)

    act = out[:, :A].reshape(S, B, A)
    lp = out[:, A:].reshape(S, B, A)
    return jnp.swapaxes(act, 0, 1), jnp.swapaxes(lp, 0, 1)


# ----------------------------- pure-JAX reference ----------------------------
def reference_forward(params, obs, lstm_hxs, eps):
    hx, cx = lstm_hxs
    B, S, F = obs.shape
    H = hx.shape[-1]
    x = jnp.maximum(
        jnp.dot(obs.reshape(B * S, F), params["w_body"], precision=_HIGH)
        + params["b_body"], 0.0).reshape(B, S, H)
    outs = []
    for i in range(S):
        gates = (jnp.dot(x[:, i], params["w_ih"], precision=_HIGH) + params["b_ih"]
                 + jnp.dot(hx, params["w_hh"], precision=_HIGH) + params["b_hh"])
        i_g = jax.nn.sigmoid(gates[:, :H])
        f_g = jax.nn.sigmoid(gates[:, H:2 * H])
        g_g = jnp.tanh(gates[:, 2 * H:3 * H])
        o_g = jax.nn.sigmoid(gates[:, 3 * H:])
        cx = f_g * cx + i_g * g_g
        hx = o_g * jnp.tanh(cx)
        outs.append(hx)
    h = jnp.stack(outs, axis=1)                                   # (B, S, H)
    mu = jnp.dot(h, params["w_mu"], precision=_HIGH) + params["b_mu"]
    log_std = jnp.clip(jnp.dot(h, params["w_ls"], precision=_HIGH)
                       + params["b_ls"], -20.0, 2.0)
    std = jnp.exp(log_std)
    x_t = mu + std * eps
    action = jnp.tanh(x_t)
    log_prob = (-((x_t - mu) ** 2) / (2.0 * std * std)
                - log_std - _LOG_SQRT_2PI)
    log_prob = log_prob - jnp.log(1.0 - action * action + 1e-7)
    return action, log_prob


def init_params(key, f, n_outputs, hidden):
    """Deterministic init, PyTorch-style U(-1/sqrt(fan_in), 1/sqrt(fan_in))."""
    H, A = hidden, n_outputs
    ks = jax.random.split(key, 10)

    def u(k, shape, fan_in):
        b = 1.0 / math.sqrt(fan_in)
        return jax.random.uniform(k, shape, jnp.float32, -b, b)

    return dict(
        w_body=u(ks[0], (f, H), f),        b_body=u(ks[1], (1, H), f),
        w_ih=u(ks[2], (H, 4 * H), H),      b_ih=u(ks[3], (1, 4 * H), H),
        w_hh=u(ks[4], (H, 4 * H), H),      b_hh=u(ks[5], (1, 4 * H), H),
        w_mu=u(ks[6], (H, A), H),          b_mu=u(ks[7], (1, A), H),
        w_ls=u(ks[8], (H, A), H),          b_ls=u(ks[9], (1, A), H),
    )


if __name__ == "__main__":
    B, S, F, H, A = 2, 8, 16, 32, 4   # batch, seq, input_size f, hidden, n_outputs

    key = jax.random.PRNGKey(0)
    kp, ko, kh, kc, ke = jax.random.split(key, 5)
    params = init_params(kp, F, A, H)
    obs = jax.random.normal(ko, (B, S, F), jnp.float32)
    hx0 = jax.random.normal(kh, (B, H), jnp.float32)
    cx0 = jax.random.normal(kc, (B, H), jnp.float32)
    # TODO(synk): torch Normal.rsample() noise is generated host-side (jax.random)
    # and fed to the kernel instead of using pltpu.prng_seed/prng_random_bits, so
    # the kernel stays deterministic and comparable against the reference.
    eps = jax.random.normal(ke, (B, S, A), jnp.float32)

    action, log_prob = jax.jit(mlp_lstm_actor_forward)(params, obs, (hx0, cx0), eps)
    jax.block_until_ready((action, log_prob))

    ref_a, ref_lp = reference_forward(params, obs, (hx0, cx0), eps)
    assert action.shape == (B, S, A) and log_prob.shape == (B, S, A)
    assert jnp.allclose(action, ref_a, atol=1e-4, rtol=1e-4), "action mismatch"
    assert jnp.allclose(log_prob, ref_lp, atol=1e-3, rtol=1e-3), "log_prob mismatch"

    print("KERNEL_OK")
</pallas_src>

<mosaic_0001>
module attributes {stable_mosaic.version = 11 : i64} {
  func.func @_actor_kernel(%arg0: memref<16x16xf32, #tpu.memory_space<vmem>>, %arg1: memref<2x32xf32, #tpu.memory_space<vmem>>, %arg2: memref<2x32xf32, #tpu.memory_space<vmem>>, %arg3: memref<16x4xf32, #tpu.memory_space<vmem>>, %arg4: memref<16x32xf32, #tpu.memory_space<vmem>>, %arg5: memref<1x32xf32, #tpu.memory_space<vmem>>, %arg6: memref<32x128xf32, #tpu.memory_space<vmem>>, %arg7: memref<1x128xf32, #tpu.memory_space<vmem>>, %arg8: memref<32x128xf32, #tpu.memory_space<vmem>>, %arg9: memref<32x8xf32, #tpu.memory_space<vmem>>, %arg10: memref<1x8xf32, #tpu.memory_space<vmem>>, %arg11: memref<16x8xf32, #tpu.memory_space<vmem>>) attributes {dimension_semantics = [], scalar_prefetch = 0 : i64, scratch_operands = 0 : i64, tpu.core_type = #tpu.core_type<tc>} {
    %c0 = arith.constant 0 : index
    %c0_0 = arith.constant 0 : index
    %0 = vector.load %arg0[%c0, %c0_0] : memref<16x16xf32, #tpu.memory_space<vmem>>, vector<16x16xf32>
    %c0_1 = arith.constant 0 : index
    %c0_2 = arith.constant 0 : index
    %1 = vector.load %arg4[%c0_1, %c0_2] : memref<16x32xf32, #tpu.memory_space<vmem>>, vector<16x32xf32>
    %cst = arith.constant dense<0.000000e+00> : vector<16x32xf32>
    %2 = tpu.matmul %0, %1, %cst {dimension_numbers = #tpu.dot_dimension_numbers<[1], [0], [0], [1], [0, 0, 1, 1], [], []>, precision = #tpu.contract_precision<fp32>} : vector<16x16xf32>, vector<16x32xf32>, vector<16x32xf32> -> vector<16x32xf32>
    %c0_3 = arith.constant 0 : index
    %c0_4 = arith.constant 0 : index
    %3 = vector.load %arg5[%c0_3, %c0_4] : memref<1x32xf32, #tpu.memory_space<vmem>>, vector<1x32xf32>
    %4 = vector.broadcast %3 : vector<1x32xf32> to vector<16x32xf32>
    %5 = arith.addf %2, %4 : vector<16x32xf32>
    %cst_5 = arith.constant 0.000000e+00 : f32
    %6 = vector.broadcast %cst_5 : f32 to vector<16x32xf32>
    %7 = arith.maximumf %5, %6 : vector<16x32xf32>
    %c0_6 = arith.constant 0 : index
    %c0_7 = arith.constant 0 : index
    %8 = vector.load %arg6[%c0_6, %c0_7] : memref<32x128xf32, #tpu.memory_space<vmem>>, vector<32x128xf32>
    %cst_8 = arith.constant dense<0.000000e+00> : vector<16x128xf32>
    %9 = tpu.matmul %7, %8, %cst_8 {dimension_numbers = #tpu.dot_dimension_numbers<[1], [0], [0], [1], [0, 0, 1, 1], [], []>, precision = #tpu.contract_precision<fp32>} : vector<16x32xf32>, vector<32x128xf32>, vector<16x128xf32> -> vector<16x128xf32>
    %c0_9 = arith.constant 0 : index
    %c0_10 = arith.constant 0 : index
    %10 = vector.load %arg7[%c0_9, %c0_10] : memref<1x128xf32, #tpu.memory_space<vmem>>, vector<1x128xf32>
    %11 = vector.broadcast %10 : vector<1x128xf32> to vector<16x128xf32>
    %12 = arith.addf %9, %11 : vector<16x128xf32>
    %c0_11 = arith.constant 0 : index
    %c0_12 = arith.constant 0 : index
    %13 = vector.load %arg8[%c0_11, %c0_12] : memref<32x128xf32, #tpu.memory_space<vmem>>, vector<32x128xf32>
    %c0_13 = arith.constant 0 : index
    %c0_14 = arith.constant 0 : index
    %14 = vector.load %arg1[%c0_13, %c0_14] : memref<2x32xf32, #tpu.memory_space<vmem>>, vector<2x32xf32>
    %c0_15 = arith.constant 0 : index
    %c0_16 = arith.constant 0 : index
    %15 = vector.load %arg2[%c0_15, %c0_16] : memref<2x32xf32, #tpu.memory_space<vmem>>, vector<2x32xf32>
    %16 = vector.extract_strided_slice %12 {offsets = [0, 0], sizes = [2, 128], strides = [1, 1]} : vector<16x128xf32> to vector<2x128xf32>
    %cst_17 = arith.constant dense<0.000000e+00> : vector<2x128xf32>
    %17 = tpu.matmul %14, %13, %cst_17 {dimension_numbers = #tpu.dot_dimension_numbers<[1], [0], [0], [1], [0, 0, 1, 1], [], []>, precision = #tpu.contract_precision<fp32>} : vector<2x32xf32>, vector<32x128xf32>, vector<2x128xf32> -> vector<2x128xf32>
    %18 = arith.addf %16, %17 : vector<2x128xf32>
    %19 = vector.extract_strided_slice %18 {offsets = [0, 0], sizes = [2, 32], strides = [1, 1]} : vector<2x128xf32> to vector<2x32xf32>
    %20 = arith.negf %19 : vector<2x32xf32>
    %21 = math.exp %20 : vector<2x32xf32>
    %cst_18 = arith.constant 1.000000e+00 : f32
    %22 = vector.broadcast %cst_18 : f32 to vector<2x32xf32>
    %23 = arith.addf %22, %21 : vector<2x32xf32>
    %24 = arith.divf %22, %23 : vector<2x32xf32>
    %25 = vector.extract_strided_slice %18 {offsets = [0, 32], sizes = [2, 32], strides = [1, 1]} : vector<2x128xf32> to vector<2x32xf32>
    %26 = arith.negf %25 : vector<2x32xf32>
    %27 = math.exp %26 : vector<2x32xf32>
    %cst_19 = arith.constant 1.000000e+00 : f32
    %28 = vector.broadcast %cst_19 : f32 to vector<2x32xf32>
    %29 = arith.addf %28, %27 : vector<2x32xf32>
    %30 = arith.divf %28, %29 : vector<2x32xf32>
    %31 = vector.extract_strided_slice %18 {offsets = [0, 64], sizes = [2, 32], strides = [1, 1]} : vector<2x128xf32> to vector<2x32xf32>
    %32 = math.tanh %31 : vector<2x32xf32>
    %33 = vector.extract_strided_slice %18 {offsets = [0, 96], sizes = [2, 32], strides = [1, 1]} : vector<2x128xf32> to vector<2x32xf32>
    %34 = arith.negf %33 : vector<2x32xf32>
    %35 = math.exp %34 : vector<2x32xf32>
    %cst_20 = arith.constant 1.000000e+00 : f32
    %36 = vector.broadcast %cst_20 : f32 to vector<2x32xf32>
    %37 = arith.addf %36, %35 : vector<2x32xf32>
    %38 = arith.divf %36, %37 : vector<2x32xf32>
    %39 = arith.mulf %30, %15 : vector<2x32xf32>
    %40 = arith.mulf %24, %32 : vector<2x32xf32>
    %41 = arith.addf %39, %40 : vector<2x32xf32>
    %42 = math.tanh %41 : vector<2x32xf32>
    %43 = arith.mulf %38, %42 : vector<2x32xf32>
    %44 = vector.extract_strided_slice %12 {offsets = [2, 0], sizes = [2, 128], strides = [1, 1]} : vector<16x128xf32> to vector<2x128xf32>
    %cst_21 = arith.constant dense<0.000000e+00> : vector<2x128xf32>
    %45 = tpu.matmul %43, %13, %cst_21 {dimension_numbers = #tpu.dot_dimension_numbers<[1], [0], [0], [1], [0, 0, 1, 1], [], []>, precision = #tpu.contract_precision<fp32>} : vector<2x32xf32>, vector<32x128xf32>, vector<2x128xf32> -> vector<2x128xf32>
    %46 = arith.addf %44, %45 : vector<2x128xf32>
    %47 = vector.extract_strided_slice %46 {offsets = [0, 0], sizes = [2, 32], strides = [1, 1]} : vector<2x128xf32> to vector<2x32xf32>
    %48 = arith.negf %47 : vector<2x32xf32>
    %49 = math.exp %48 : vector<2x32xf32>
    %cst_22 = arith.constant 1.000000e+00 : f32
    %50 = vector.broadcast %cst_22 : f32 to vector<2x32xf32>
    %51 = arith.addf %50, %49 : vector<2x32xf32>
    %52 = arith.divf %50, %51 : vector<2x32xf32>
    %53 = vector.extract_strided_slice %46 {offsets = [0, 32], sizes = [2, 32], strides = [1, 1]} : vector<2x128xf32> to vector<2x32xf32>
    %54 = arith.negf %53 : vector<2x32xf32>
    %55 = math.exp %54 : vector<2x32xf32>
    %cst_23 = arith.constant 1.000000e+00 : f32
    %56 = vector.broadcast %cst_23 : f32 to vector<2x32xf32>
    %57 = arith.addf %56, %55 : vector<2x32xf32>
    %58 = arith.divf %56, %57 : vector<2x32xf32>
    %59 = vector.extract_strided_slice %46 {offsets = [0, 64], sizes = [2, 32], strides = [1, 1]} : vector<2x128xf32> to vector<2x32xf32>
    %60 = math.tanh %59 : vector<2x32xf32>
    %61 = vector.extract_strided_slice %46 {offsets = [0, 96], sizes = [2, 32], strides = [1, 1]} : vector<2x128xf32> to vector<2x32xf32>
    %62 = arith.negf %61 : vector<2x32xf32>
    %63 = math.exp %62 : vector<2x32xf32>
    %cst_24 = arith.constant 1.000000e+00 : f32
    %64 = vector.broadcast %cst_24 : f32 to vector<2x32xf32>
    %65 = arith.addf %64, %63 : vector<2x32xf32>
    %66 = arith.divf %64, %65 : vector<2x32xf32>
    %67 = arith.mulf %58, %41 : vector<2x32xf32>
    %68 = arith.mulf %52, %60 : vector<2x32xf32>
    %69 = arith.addf %67, %68 : vector<2x32xf32>
    %70 = math.tanh %69 : vector<2x32xf32>
    %71 = arith.mulf %66, %70 : vector<2x32xf32>
    %72 = vector.extract_strided_slice %12 {offsets = [4, 0], sizes = [2, 128], strides = [1, 1]} : vector<16x128xf32> to vector<2x128xf32>
    %cst_25 = arith.constant dense<0.000000e+00> : vector<2x128xf32>
    %73 = tpu.matmul %71, %13, %cst_25 {dimension_numbers = #tpu.dot_dimension_numbers<[1], [0], [0], [1], [0, 0, 1, 1], [], []>, precision = #tpu.contract_precision<fp32>} : vector<2x32xf32>, vector<32x128xf32>, vector<2x128xf32> -> vector<2x128xf32>
    %74 = arith.addf %72, %73 : vector<2x128xf32>
    %75 = vector.extract_strided_slice %74 {offsets = [0, 0], sizes = [2, 32], strides = [1, 1]} : vector<2x128xf32> to vector<2x32xf32>
    %76 = arith.negf %75 : vector<2x32xf32>
    %77 = math.exp %76 : vector<2x32xf32>
    %cst_26 = arith.constant 1.000000e+00 : f32
    %78 = vector.broadcast %cst_26 : f32 to vector<2x32xf32>
    %79 = arith.addf %78, %77 : vector<2x32xf32>
    %80 = arith.divf %78, %79 : vector<2x32xf32>
    %81 = vector.extract_strided_slice %74 {offsets = [0, 32], sizes = [2, 32], strides = [1, 1]} : vector<2x128xf32> to vector<2x32xf32>
    %82 = arith.negf %81 : vector<2x32xf32>
    %83 = math.exp %82 : vector<2x32xf32>
    %cst_27 = arith.constant 1.000000e+00 : f32
    %84 = vector.broadcast %cst_27 : f32 to vector<2x32xf32>
    %85 = arith.addf %84, %83 : vector<2x32xf32>
    %86 = arith.divf %84, %85 : vector<2x32xf32>
    %87 = vector.extract_strided_slice %74 {offsets = [0, 64], sizes = [2, 32], strides = [1, 1]} : vector<2x128xf32> to vector<2x32xf32>
    %88 = math.tanh %87 : vector<2x32xf32>
    %89 = vector.extract_strided_slice %74 {offsets = [0, 96], sizes = [2, 32], strides = [1, 1]} : vector<2x128xf32> to vector<2x32xf32>
    %90 = arith.negf %89 : vector<2x32xf32>
    %91 = math.exp %90 : vector<2x32xf32>
    %cst_28 = arith.constant 1.000000e+00 : f32
    %92 = vector.broadcast %cst_28 : f32 to vector<2x32xf32>
    %93 = arith.addf %92, %91 : vector<2x32xf32>
    %94 = arith.divf %92, %93 : vector<2x32xf32>
    %95 = arith.mulf %86, %69 : vector<2x32xf32>
    %96 = arith.mulf %80, %88 : vector<2x32xf32>
    %97 = arith.addf %95, %96 : vector<2x32xf32>
    %98 = math.tanh %97 : vector<2x32xf32>
    %99 = arith.mulf %94, %98 : vector<2x32xf32>
    %100 = vector.extract_strided_slice %12 {offsets = [6, 0], sizes = [2, 128], strides = [1, 1]} : vector<16x128xf32> to vector<2x128xf32>
    %cst_29 = arith.constant dense<0.000000e+00> : vector<2x128xf32>
    %101 = tpu.matmul %99, %13, %cst_29 {dimension_numbers = #tpu.dot_dimension_numbers<[1], [0], [0], [1], [0, 0, 1, 1], [], []>, precision = #tpu.contract_precision<fp32>} : vector<2x32xf32>, vector<32x128xf32>, vector<2x128xf32> -> vector<2x128xf32>
    %102 = arith.addf %100, %101 : vector<2x128xf32>
    %103 = vector.extract_strided_slice %102 {offsets = [0, 0], sizes = [2, 32], strides = [1, 1]} : vector<2x128xf32> to vector<2x32xf32>
    %104 = arith.negf %103 : vector<2x32xf32>
    %105 = math.exp %104 : vector<2x32xf32>
    %cst_30 = arith.constant 1.000000e+00 : f32
    %106 = vector.broadcast %cst_30 : f32 to vector<2x32xf32>
    %107 = arith.addf %106, %105 : vector<2x32xf32>
    %108 = arith.divf %106, %107 : vector<2x32xf32>
    %109 = vector.extract_strided_slice %102 {offsets = [0, 32], sizes = [2, 32], strides = [1, 1]} : vector<2x128xf32> to vector<2x32xf32>
    %110 = arith.negf %109 : vector<2x32xf32>
    %111 = math.exp %110 : vector<2x32xf32>
    %cst_31 = arith.constant 1.000000e+00 : f32
    %112 = vector.broadcast %cst_31 : f32 to vector<2x32xf32>
    %113 = arith.addf %112, %111 : vector<2x32xf32>
    %114 = arith.divf %112, %113 : vector<2x32xf32>
    %115 = vector.extract_strided_slice %102 {offsets = [0, 64], sizes = [2, 32], strides = [1, 1]} : vector<2x128xf32> to vector<2x32xf32>
    %116 = math.tanh %115 : vector<2x32xf32>
    %117 = vector.extract_strided_slice %102 {offsets = [0, 96], sizes = [2, 32], strides = [1, 1]} : vector<2x128xf32> to vector<2x32xf32>
    %118 = arith.negf %117 : vector<2x32xf32>
    %119 = math.exp %118 : vector<2x32xf32>
    %cst_32 = arith.constant 1.000000e+00 : f32
    %120 = vector.broadcast %cst_32 : f32 to vector<2x32xf32>
    %121 = arith.addf %120, %119 : vector<2x32xf32>
    %122 = arith.divf %120, %121 : vector<2x32xf32>
    %123 = arith.mulf %114, %97 : vector<2x32xf32>
    %124 = arith.mulf %108, %116 : vector<2x32xf32>
    %125 = arith.addf %123, %124 : vector<2x32xf32>
    %126 = math.tanh %125 : vector<2x32xf32>
    %127 = arith.mulf %122, %126 : vector<2x32xf32>
    %128 = vector.extract_strided_slice %12 {offsets = [8, 0], sizes = [2, 128], strides = [1, 1]} : vector<16x128xf32> to vector<2x128xf32>
    %cst_33 = arith.constant dense<0.000000e+00> : vector<2x128xf32>
    %129 = tpu.matmul %127, %13, %cst_33 {dimension_numbers = #tpu.dot_dimension_numbers<[1], [0], [0], [1], [0, 0, 1, 1], [], []>, precision = #tpu.contract_precision<fp32>} : vector<2x32xf32>, vector<32x128xf32>, vector<2x128xf32> -> vector<2x128xf32>
    %130 = arith.addf %128, %129 : vector<2x128xf32>
    %131 = vector.extract_strided_slice %130 {offsets = [0, 0], sizes = [2, 32], strides = [1, 1]} : vector<2x128xf32> to vector<2x32xf32>
    %132 = arith.negf %131 : vector<2x32xf32>
    %133 = math.exp %132 : vector<2x32xf32>
    %cst_34 = arith.constant 1.000000e+00 : f32
    %134 = vector.broadcast %cst_34 : f32 to vector<2x32xf32>
    %135 = arith.addf %134, %133 : vector<2x32xf32>
    %136 = arith.divf %134, %135 : vector<2x32xf32>
    %137 = vector.extract_strided_slice %130 {offsets = [0, 32], sizes = [2, 32], strides = [1, 1]} : vector<2x128xf32> to vector<2x32xf32>
    %138 = arith.negf %137 : vector<2x32xf32>
    %139 = math.exp %138 : vector<2x32xf32>
    %cst_35 = arith.constant 1.000000e+00 : f32
    %140 = vector.broadcast %cst_35 : f32 to vector<2x32xf32>
    %141 = arith.addf %140, %139 : vector<2x32xf32>
    %142 = arith.divf %140, %141 : vector<2x32xf32>
    %143 = vector.extract_strided_slice %130 {offsets = [0, 64], sizes = [2, 32], strides = [1, 1]} : vector<2x128xf32> to vector<2x32xf32>
    %144 = math.tanh %143 : vector<2x32xf32>
    %145 = vector.extract_strided_slice %130 {offsets = [0, 96], sizes = [2, 32], strides = [1, 1]} : vector<2x128xf32> to vector<2x32xf32>
    %146 = arith.negf %145 : vector<2x32xf32>
    %147 = math.exp %146 : vector<2x32xf32>
    %cst_36 = arith.constant 1.000000e+00 : f32
    %148 = vector.broadcast %cst_36 : f32 to vector<2x32xf32>
    %149 = arith.addf %148, %147 : vector<2x32xf32>
    %150 = arith.divf %148, %149 : vector<2x32xf32>
    %151 = arith.mulf %142, %125 : vector<2x32xf32>
    %152 = arith.mulf %136, %144 : vector<2x32xf32>
    %153 = arith.addf %151, %152 : vector<2x32xf32>
    %154 = math.tanh %153 : vector<2x32xf32>
    %155 = arith.mulf %150, %154 : vector<2x32xf32>
    %156 = vector.extract_strided_slice %12 {offsets = [10, 0], sizes = [2, 128], strides = [1, 1]} : vector<16x128xf32> to vector<2x128xf32>
    %cst_37 = arith.constant dense<0.000000e+00> : vector<2x128xf32>
    %157 = tpu.matmul %155, %13, %cst_37 {dimension_numbers = #tpu.dot_dimension_numbers<[1], [0], [0], [1], [0, 0, 1, 1], [], []>, precision = #tpu.contract_precision<fp32>} : vector<2x32xf32>, vector<32x128xf32>, vector<2x128xf32> -> vector<2x128xf32>
    %158 = arith.addf %156, %157 : vector<2x128xf32>
    %159 = vector.extract_strided_slice %158 {offsets = [0, 0], sizes = [2, 32], strides = [1, 1]} : vector<2x128xf32> to vector<2x32xf32>
    %160 = arith.negf %159 : vector<2x32xf32>
    %161 = math.exp %160 : vector<2x32xf32>
    %cst_38 = arith.constant 1.000000e+00 : f32
    %162 = vector.broadcast %cst_38 : f32 to vector<2x32xf32>
    %163 = arith.addf %162, %161 : vector<2x32xf32>
    %164 = arith.divf %162, %163 : vector<2x32xf32>
    %165 = vector.extract_strided_slice %158 {offsets = [0, 32], sizes = [2, 32], strides = [1, 1]} : vector<2x128xf32> to vector<2x32xf32>
    %166 = arith.negf %165 : vector<2x32xf32>
    %167 = math.exp %166 : vector<2x32xf32>
    %cst_39 = arith.constant 1.000000e+00 : f32
    %168 = vector.broadcast %cst_39 : f32 to vector<2x32xf32>
    %169 = arith.addf %168, %167 : vector<2x32xf32>
    %170 = arith.divf %168, %169 : vector<2x32xf32>
    %171 = vector.extract_strided_slice %158 {offsets = [0, 64], sizes = [2, 32], strides = [1, 1]} : vector<2x128xf32> to vector<2x32xf32>
    %172 = math.tanh %171 : vector<2x32xf32>
    %173 = vector.extract_strided_slice %158 {offsets = [0, 96], sizes = [2, 32], strides = [1, 1]} : vector<2x128xf32> to vector<2x32xf32>
    %174 = arith.negf %173 : vector<2x32xf32>
    %175 = math.exp %174 : vector<2x32xf32>
    %cst_40 = arith.constant 1.000000e+00 : f32
    %176 = vector.broadcast %cst_40 : f32 to vector<2x32xf32>
    %177 = arith.addf %176, %175 : vector<2x32xf32>
    %178 = arith.divf %176, %177 : vector<2x32xf32>
    %179 = arith.mulf %170, %153 : vector<2x32xf32>
    %180 = arith.mulf %164, %172 : vector<2x32xf32>
    %181 = arith.addf %179, %180 : vector<2x32xf32>
    %182 = math.tanh %181 : vector<2x32xf32>
    %183 = arith.mulf %178, %182 : vector<2x32xf32>
    %184 = vector.extract_strided_slice %12 {offsets = [12, 0], sizes = [2, 128], strides = [1, 1]} : vector<16x128xf32> to vector<2x128xf32>
    %cst_41 = arith.constant dense<0.000000e+00> : vector<2x128xf32>
    %185 = tpu.matmul %183, %13, %cst_41 {dimension_numbers = #tpu.dot_dimension_numbers<[1], [0], [0], [1], [0, 0, 1, 1], [], []>, precision = #tpu.contract_precision<fp32>} : vector<2x32xf32>, vector<32x128xf32>, vector<2x128xf32> -> vector<2x128xf32>
    %186 = arith.addf %184, %185 : vector<2x128xf32>
    %187 = vector.extract_strided_slice %186 {offsets = [0, 0], sizes = [2, 32], strides = [1, 1]} : vector<2x128xf32> to vector<2x32xf32>
    %188 = arith.negf %187 : vector<2x32xf32>
    %189 = math.exp %188 : vector<2x32xf32>
    %cst_42 = arith.constant 1.000000e+00 : f32
    %190 = vector.broadcast %cst_42 : f32 to vector<2x32xf32>
    %191 = arith.addf %190, %189 : vector<2x32xf32>
    %192 = arith.divf %190, %191 : vector<2x32xf32>
    %193 = vector.extract_strided_slice %186 {offsets = [0, 32], sizes = [2, 32], strides = [1, 1]} : vector<2x128xf32> to vector<2x32xf32>
    %194 = arith.negf %193 : vector<2x32xf32>
    %195 = math.exp %194 : vector<2x32xf32>
    %cst_43 = arith.constant 1.000000e+00 : f32
    %196 = vector.broadcast %cst_43 : f32 to vector<2x32xf32>
    %197 = arith.addf %196, %195 : vector<2x32xf32>
    %198 = arith.divf %196, %197 : vector<2x32xf32>
    %199 = vector.extract_strided_slice %186 {offsets = [0, 64], sizes = [2, 32], strides = [1, 1]} : vector<2x128xf32> to vector<2x32xf32>
    %200 = math.tanh %199 : vector<2x32xf32>
    %201 = vector.extract_strided_slice %186 {offsets = [0, 96], sizes = [2, 32], strides = [1, 1]} : vector<2x128xf32> to vector<2x32xf32>
    %202 = arith.negf %201 : vector<2x32xf32>
    %203 = math.exp %202 : vector<2x32xf32>
    %cst_44 = arith.constant 1.000000e+00 : f32
    %204 = vector.broadcast %cst_44 : f32 to vector<2x32xf32>
    %205 = arith.addf %204, %203 : vector<2x32xf32>
    %206 = arith.divf %204, %205 : vector<2x32xf32>
    %207 = arith.mulf %198, %181 : vector<2x32xf32>
    %208 = arith.mulf %192, %200 : vector<2x32xf32>
    %209 = arith.addf %207, %208 : vector<2x32xf32>
    %210 = math.tanh %209 : vector<2x32xf32>
    %211 = arith.mulf %206, %210 : vector<2x32xf32>
    %212 = vector.extract_strided_slice %12 {offsets = [14, 0], sizes = [2, 128], strides = [1, 1]} : vector<16x128xf32> to vector<2x128xf32>
    %cst_45 = arith.constant dense<0.000000e+00> : vector<2x128xf32>
    %213 = tpu.matmul %211, %13, %cst_45 {dimension_numbers = #tpu.dot_dimension_numbers<[1], [0], [0], [1], [0, 0, 1, 1], [], []>, precision = #tpu.contract_precision<fp32>} : vector<2x32xf32>, vector<32x128xf32>, vector<2x128xf32> -> vector<2x128xf32>
    %214 = arith.addf %212, %213 : vector<2x128xf32>
    %215 = vector.extract_strided_slice %214 {offsets = [0, 0], sizes = [2, 32], strides = [1, 1]} : vector<2x128xf32> to vector<2x32xf32>
    %216 = arith.negf %215 : vector<2x32xf32>
    %217 = math.exp %216 : vector<2x32xf32>
    %cst_46 = arith.constant 1.000000e+00 : f32
    %218 = vector.broadcast %cst_46 : f32 to vector<2x32xf32>
    %219 = arith.addf %218, %217 : vector<2x32xf32>
    %220 = arith.divf %218, %219 : vector<2x32xf32>
    %221 = vector.extract_strided_slice %214 {offsets = [0, 32], sizes = [2, 32], strides = [1, 1]} : vector<2x128xf32> to vector<2x32xf32>
    %222 = arith.negf %221 : vector<2x32xf32>
    %223 = math.exp %222 : vector<2x32xf32>
    %cst_47 = arith.constant 1.000000e+00 : f32
    %224 = vector.broadcast %cst_47 : f32 to vector<2x32xf32>
    %225 = arith.addf %224, %223 : vector<2x32xf32>
    %226 = arith.divf %224, %225 : vector<2x32xf32>
    %227 = vector.extract_strided_slice %214 {offsets = [0, 64], sizes = [2, 32], strides = [1, 1]} : vector<2x128xf32> to vector<2x32xf32>
    %228 = math.tanh %227 : vector<2x32xf32>
    %229 = vector.extract_strided_slice %214 {offsets = [0, 96], sizes = [2, 32], strides = [1, 1]} : vector<2x128xf32> to vector<2x32xf32>
    %230 = arith.negf %229 : vector<2x32xf32>
    %231 = math.exp %230 : vector<2x32xf32>
    %cst_48 = arith.constant 1.000000e+00 : f32
    %232 = vector.broadcast %cst_48 : f32 to vector<2x32xf32>
    %233 = arith.addf %232, %231 : vector<2x32xf32>
    %234 = arith.divf %232, %233 : vector<2x32xf32>
    %235 = arith.mulf %226, %209 : vector<2x32xf32>
    %236 = arith.mulf %220, %228 : vector<2x32xf32>
    %237 = arith.addf %235, %236 : vector<2x32xf32>
    %238 = math.tanh %237 : vector<2x32xf32>
    %239 = arith.mulf %234, %238 : vector<2x32xf32>
    %240 = tpu.concatenate %43, %71, %99, %127, %155, %183, %211, %239 in 0 : vector<2x32xf32>, vector<2x32xf32>, vector<2x32xf32>, vector<2x32xf32>, vector<2x32xf32>, vector<2x32xf32>, vector<2x32xf32>, vector<2x32xf32> -> vector<16x32xf32>
    %c0_49 = arith.constant 0 : index
    %c0_50 = arith.constant 0 : index
    %241 = vector.load %arg9[%c0_49, %c0_50] : memref<32x8xf32, #tpu.memory_space<vmem>>, vector<32x8xf32>
    %cst_51 = arith.constant dense<0.000000e+00> : vector<16x8xf32>
    %242 = tpu.matmul %240, %241, %cst_51 {dimension_numbers = #tpu.dot_dimension_numbers<[1], [0], [0], [1], [0, 0, 1, 1], [], []>, precision = #tpu.contract_precision<fp32>} : vector<16x32xf32>, vector<32x8xf32>, vector<16x8xf32> -> vector<16x8xf32>
    %c0_52 = arith.constant 0 : index
    %c0_53 = arith.constant 0 : index
    %243 = vector.load %arg10[%c0_52, %c0_53] : memref<1x8xf32, #tpu.memory_space<vmem>>, vector<1x8xf32>
    %244 = vector.broadcast %243 : vector<1x8xf32> to vector<16x8xf32>
    %245 = arith.addf %242, %244 : vector<16x8xf32>
    %246 = vector.extract_strided_slice %245 {offsets = [0, 0], sizes = [16, 4], strides = [1, 1]} : vector<16x8xf32> to vector<16x4xf32>
    %247 = vector.extract_strided_slice %245 {offsets = [0, 4], sizes = [16, 4], strides = [1, 1]} : vector<16x8xf32> to vector<16x4xf32>
    %cst_54 = arith.constant -2.000000e+01 : f32
    %cst_55 = arith.constant 2.000000e+00 : f32
    %248 = vector.broadcast %cst_54 : f32 to vector<16x4xf32>
    %249 = arith.maximumf %248, %247 : vector<16x4xf32>
    %250 = vector.broadcast %cst_55 : f32 to vector<16x4xf32>
    %251 = arith.minimumf %250, %249 : vector<16x4xf32>
    %252 = math.exp %251 : vector<16x4xf32>
    %c0_56 = arith.constant 0 : index
    %c0_57 = arith.constant 0 : index
    %253 = vector.load %arg3[%c0_56, %c0_57] : memref<16x4xf32, #tpu.memory_space<vmem>>, vector<16x4xf32>
    %254 = arith.mulf %252, %253 : vector<16x4xf32>
    %255 = arith.addf %246, %254 : vector<16x4xf32>
    %256 = math.tanh %255 : vector<16x4xf32>
    %257 = arith.subf %255, %246 : vector<16x4xf32>
    %258 = arith.mulf %257, %257 : vector<16x4xf32>
    %cst_58 = arith.constant 0.000000e+00 : f32
    %259 = vector.broadcast %cst_58 : f32 to vector<16x4xf32>
    %260 = arith.subf %259, %258 : vector<16x4xf32>
    %cst_59 = arith.constant 2.000000e+00 : f32
    %261 = vector.broadcast %cst_59 : f32 to vector<16x4xf32>
    %262 = arith.mulf %261, %252 : vector<16x4xf32>
    %263 = arith.mulf %262, %252 : vector<16x4xf32>
    %264 = arith.divf %260, %263 : vector<16x4xf32>
    %265 = arith.subf %264, %251 : vector<16x4xf32>
    %cst_60 = arith.constant 0.918938517 : f32
    %266 = vector.broadcast %cst_60 : f32 to vector<16x4xf32>
    %267 = arith.subf %265, %266 : vector<16x4xf32>
    %268 = arith.mulf %256, %256 : vector<16x4xf32>
    %cst_61 = arith.constant 1.000000e+00 : f32
    %269 = vector.broadcast %cst_61 : f32 to vector<16x4xf32>
    %270 = arith.subf %269, %268 : vector<16x4xf32>
    %cst_62 = arith.constant 1.000000e-07 : f32
    %271 = vector.broadcast %cst_62 : f32 to vector<16x4xf32>
    %272 = arith.addf %270, %271 : vector<16x4xf32>
    %273 = math.log %272 : vector<16x4xf32>
    %274 = arith.subf %267, %273 : vector<16x4xf32>
    %275 = tpu.concatenate %256, %274 in 1 : vector<16x4xf32>, vector<16x4xf32> -> vector<16x8xf32>
    %c0_63 = arith.constant 0 : index
    %c0_64 = arith.constant 0 : index
    %276 = vector.load %arg11[%c0_63, %c0_64] : memref<16x8xf32, #tpu.memory_space<vmem>>, vector<16x8xf32>
    tpu.vector_store %arg11[%c0_63, %c0_64], %275 {strides = array<i32>} : memref<16x8xf32, #tpu.memory_space<vmem>>, vector<16x8xf32>,
    return
  }
}

</mosaic_0001>

<bundles_post_ra>
// kernel: mlp_lstm_actor_forward.1
= control target key start
LH: loop header
LB: loop body
LE: loop exit
PB: predicated region body
PF: predicated region fallthrough
CT: control target
= control target key end

     0   :  { %vm46_vm0 = vcmask 130048   ;;  %vm253_vm1 = vcmask 261120   ;;  %s2819_s24 = smov 32   ;;  %vm2352_vm14 = vcmask 1041408   ;;  %vm2354_vm15 = vcmask 1043456   ;;  %s2820_s13 = smov 4   ;;  %s3340_s4 = inlined_call_operand.vmem [shape: f32[16,32], index: 4, kind: input, shape index: {}]   ;;  %s3341_s0 = inlined_call_operand.vmem [shape: f32[16,16], index: 0, kind: input, shape index: {}]   ;;  %s3342_s5 = inlined_call_operand.vmem [shape: f32[1,32], index: 5, kind: input, shape index: {}]   ;;  %s3343_s6 = inlined_call_operand.vmem [shape: f32[32,128], index: 6, kind: input, shape index: {}]   ;;  %s3344_s8 = inlined_call_operand.vmem [shape: f32[32,128], index: 8, kind: input, shape index: {}]   ;;  %s3345_s1 = inlined_call_operand.vmem [shape: f32[2,32], index: 1, kind: input, shape index: {}]   ;;  %s3346_s7 = inlined_call_operand.vmem [shape: f32[1,128], index: 7, kind: input, shape index: {}]   ;;  %s3347_s2 = inlined_call_operand.vmem [shape: f32[2,32], index: 2, kind: input, shape index: {}]   ;;  %s3348_s9 = inlined_call_operand.vmem [shape: f32[32,8], index: 9, kind: input, shape index: {}]   ;;  %s3349_s10 = inlined_call_operand.vmem [shape: f32[1,8], index: 10, kind: input, shape index: {}]   ;;  %s3350_s3 = inlined_call_operand.vmem [shape: f32[16,4], index: 3, kind: input, shape index: {}]   ;;  %s3351_s11 = inlined_call_operand.vmem [shape: f32[16,8], index: 11, kind: output, shape index: {}]  }
   0x1   :  { %v41_v0 = vld [vmem:[%s3340_s4 + $0x8] sm:$0xff]  ;;  %v40_v1 = vld [vmem:[%s3340_s4] sm:$0xff]  ;;  %v248_v26 = vld [vmem:[%s3343_s6 + $0x18] sm:$0xff] }
   0x2   :  { %v39_v2 = vld [vmem:[%s3341_s0 + $0x8] sm:$0xff]  ;;  %v67_v3 = vand.u32 4294901760, %v41_v0  ;;  %v69_v4 = vand.u32 4294901760, %v40_v1  ;;  %v38_v6 = vld [vmem:[%s3341_s0] sm:$0xff]  ;;  %v272_v27 = vand.u32 4294901760, %v248_v26  ;;  %v247_v28 = vld [vmem:[%s3343_s6 + $0x10] sm:$0xff] }
   0x3   :  { %v51_v5 = vsel %vm46_vm0, %v39_v2, 0  ;;  %v48_v8 = vsel %vm46_vm0, %v38_v6, 0  ;;  %v274_v30 = vand.u32 4294901760, %v247_v28  ;;  %v246_v31 = vld [vmem:[%s3343_s6 + $0x8] sm:$0xff]  ;;  %v245_v35 = vld [vmem:[%s3343_s6] sm:$0xff]  ;;  %v478_v2 = vld [vmem:[%s3344_s8 + $0x10] sm:$0xff] }
   0x4   :  { %v79_v7 = vand.u32 4294901760, %v51_v5  ;;  %2727 = vmatpush.msra.mxu2 %v67_v3  ;;  %v103_v9 = vsub.f32 %v41_v0, %v67_v3  ;;  %v109_v10 = vsub.f32 %v40_v1, %v69_v4  ;;  %68 = vmatpush.msra.mxu0 %v67_v3  ;;  %v71_v11 = vand.u32 4294901760, %v48_v8  ;;  %v2735_v51 = vld [vmem:[%s3342_s5] ss:$0 sm:$0xff]  ;;  %v479_v1 = vld [vmem:[%s3344_s8 + $0x18] sm:$0xff] }
   0x5   :  { %v310_v29 = vsub.f32 %v248_v26, %v272_v27  ;;  %v316_v33 = vsub.f32 %v247_v28, %v274_v30  ;;  %v276_v34 = vand.u32 4294901760, %v246_v31  ;;  %v278_v39 = vand.u32 4294901760, %v245_v35 }
   0x6   :  { %v80_v12 = vsub.f32 %v51_v5, %v79_v7  ;;  %2728 = vmatpush.msra.mxu2 %v69_v4  ;;  %v104_v13 = vand.u32 4294901760, %v103_v9  ;;  %v110_v14 = vand.u32 4294901760, %v109_v10  ;;  %v72_v15 = vsub.f32 %v48_v8, %v71_v11  ;;  %70 = vmatpush.msra.mxu0 %v69_v4 }
   0x7   :  { %v311_v32 = vand.u32 4294901760, %v310_v29  ;;  %v317_v37 = vand.u32 4294901760, %v316_v33  ;;  %v322_v38 = vsub.f32 %v246_v31, %v276_v34  ;;  %v328_v43 = vsub.f32 %v245_v35, %v278_v39 }
   0x8   :  { %v81_v16 = vand.u32 4294901760, %v80_v12  ;;  %139 = vmatpush.msrb.mxu2 %v103_v9  ;;  %v105_v17 = vsub.f32 %v103_v9, %v104_v13  ;;  %v111_v18 = vsub.f32 %v109_v10, %v110_v14  ;;  %v73_v19 = vand.u32 4294901760, %v72_v15  ;;  %202 = vmatpush.msrb.mxu0 %v104_v13 }
   0x9   :  { %v312_v36 = vsub.f32 %v310_v29, %v311_v32  ;;  %v318_v41 = vsub.f32 %v316_v33, %v317_v37  ;;  %v323_v42 = vand.u32 4294901760, %v322_v38  ;;  %v329_v46 = vand.u32 4294901760, %v328_v43 }
   0xa   :  { %v82_v20 = vsub.f32 %v80_v12, %v81_v16  ;;  %142 = vmatpush.msrb.mxu2 %v109_v10  ;;  %v106_v21 = vand.u32 4294901760, %v105_v17  ;;  %v112_v22 = vand.u32 4294901760, %v111_v18  ;;  %v74_v23 = vsub.f32 %v72_v15, %v73_v19  ;;  %206 = vmatpush.msrb.mxu0 %v110_v14  ;;  %v477_v14 = vld [vmem:[%s3344_s8 + $0x8] sm:$0xff] }
   0xb   :  { %v313_v40 = vand.u32 4294901760, %v312_v36  ;;  %v319_v44 = vand.u32 4294901760, %v318_v41  ;;  %v324_v45 = vsub.f32 %v322_v38, %v323_v42  ;;  %v330_v48 = vsub.f32 %v328_v43, %v329_v46 }
   0xc   :  { %v83_v24 = vand.u32 4294901760, %v82_v20  ;;  %2729 = vmatpush.msra.mxu3 %v106_v21  ;;  %107 = vmatpush.msra.mxu1 %v106_v21  ;;  %v75_v25 = vand.u32 4294901760, %v74_v23  ;;  %v2915_v5 = vand.u32 4294901760, %v479_v1  ;;  %v2917_v6 = vand.u32 4294901760, %v478_v2  ;;  %v476_v21 = vld [vmem:[%s3344_s8] sm:$0xff] }
   0xd   :  { %v325_v47 = vand.u32 4294901760, %v324_v45  ;;  %v331_v49 = vand.u32 4294901760, %v330_v48  ;;  %v2934_v18 = vand.u32 4294901760, %v477_v14  ;;  %v2955_v28 = vand.u32 4294901760, %v476_v21 }
   0xe   :  { %84 = vmatmul.f32.vlgmr.msra.gmra.mxu2 %v83_v24  ;;  %2730 = vmatpush.msra.mxu3 %v112_v22  ;;  %v2920_v10 = vsub.f32 %v479_v1, %v2915_v5 }
   0xf   :  { %76 = vmatmul.f32.vlgmr.msra.gmra.mxu0 %v75_v25  ;;  %119 = vmatmul.f32.vlgmr.msra.gmra.mxu3 %v79_v7  ;;  %v2950_v26 = vsub.f32 %v477_v14, %v2934_v18  ;;  %v2967_v35 = vsub.f32 %v476_v21, %v2955_v28 }
  0x10   :  { %113 = vmatpush.msra.mxu1 %v112_v22  ;;  %169 = vmatpush.msrb.mxu3 %v67_v3  ;;  %v2931_v17 = vand.u32 4294901760, %v2920_v10  ;;  %v480_v22 = vld [vmem:[%s3345_s1] sm:$0x3] }
  0x11   :  { %115 = vmatmul.f32.vlgmr.msra.gmra.mxu1 %v71_v11  ;;  %273 = vmatpush.msra.mxu2 %v272_v27  ;;  %v2979_v41 = vand.u32 4294901760, %v2967_v35 }
  0x12   :  { %231 = vmatpush.msrb.mxu1 %v67_v3  ;;  %171 = vmatpush.msrb.mxu3 %v69_v4  ;;  %v529_v24 = vsub.f32 %v2920_v10, %v2931_v17 }
  0x13   :  { %356 = vmatpush.msra.mxu0 %v310_v29  ;;  %275 = vmatpush.msra.mxu2 %v274_v30  ;;  %v483_v29 = vsel %vm253_vm1, %v480_v22, 0 }
  0x14   :  { %233 = vmatpush.msrb.mxu1 %v69_v4  ;;  %314 = vmatpush.msra.mxu3 %v313_v40  ;;  %v2959_v31 = vand.u32 4294901760, %v529_v24  ;;  %v2969_v36 = vand.u32 4294901760, %v483_v29 }
  0x15   :  { %359 = vmatpush.msra.mxu0 %v316_v33  ;;  %277 = vmatpush.msra.mxu2 %v276_v34  ;;  %v2964_v33 = vand.u32 4294901760, %v2950_v26 }
  0x16   :  { %145 = vmatmul.f32.vlgmr.msrb.gmra.mxu2 %v72_v15  ;;  %390 = vmatpush.msra.mxu1 %v272_v27 }
  0x17   :  { %208 = vmatmul.f32.vlgmr.msrb.gmra.mxu0 %v71_v11  ;;  %175 = vmatmul.f32.vlgmr.msrb.gmra.mxu3 %v73_v19 }
  0x18   :  { %392 = vmatpush.msra.mxu1 %v274_v30  ;;  %362 = vmatpush.msra.mxu0 %v322_v38 }
  0x19   :  { %235 = vmatmul.f32.vlgmr.msrb.gmra.mxu1 %v71_v11  ;;  %279 = vmatpush.msra.mxu2 %v278_v39  ;;  %v2924_v11 = vsub.f32 %v478_v2, %v2917_v6 }
  0x1a   :  { %394 = vmatpush.msra.mxu1 %v276_v34  ;;  %365 = vmatpush.msra.mxu0 %v328_v43 }
  0x1b   :  { %425 = vmatpush.msrb.mxu2 %v311_v32  ;;  %320 = vmatpush.msra.mxu3 %v319_v44  ;;  %v2947_v25 = vand.u32 4294901760, %v2924_v11 }
  0x1c   :  { %396 = vmatpush.msra.mxu1 %v278_v39  ;;  %498 = vmatpush.msrb.mxu0 %v2915_v5 }
  0x1d   :  { %429 = vmatpush.msrb.mxu2 %v317_v37  ;;  %326 = vmatpush.msra.mxu3 %v325_v47  ;;  %v535_v32 = vsub.f32 %v2924_v11, %v2947_v25  ;;  %v547_v47 = vsub.f32 %v2967_v35, %v2979_v41 }
  0x1e   :  { %150 = vmatmul.f32.gmra.mxu2 %v80_v12  ;;  %500 = vmatpush.msrb.mxu0 %v2917_v6 }
  0x1f   :  { %212 = vmatmul.f32.gmra.mxu0 %v79_v7  ;;  %181 = vmatmul.f32.gmra.mxu3 %v81_v16  ;;  %v2973_v38 = vand.u32 4294901760, %v535_v32 }
  0x20   :  { %433 = vmatpush.msrb.mxu2 %v323_v42  ;;  %332 = vmatpush.msra.mxu3 %v331_v49  ;;  %v2982_v42 = vsub.f32 %v483_v29, %v2969_v36 }
  0x21   :  { %239 = vmatmul.f32.gmra.mxu1 %v79_v7  ;;  %502 = vmatpush.msrb.mxu0 %v2934_v18 }
  0x22   :  { %437 = vmatpush.msrb.mxu2 %v329_v46  ;;  %460 = vmatpush.msrb.mxu3 %v272_v27  ;;  %v507_v48 = vand.u32 4294901760, %v2982_v42 }
  0x23   :  { %531 = vmatpush.msrb.mxu1 %v2959_v31  ;;  %504 = vmatpush.msrb.mxu0 %v2955_v28 }
  0x24   :  { %462 = vmatpush.msrb.mxu3 %v274_v30 }
  0x25   :  { %537 = vmatpush.msrb.mxu1 %v2973_v38 }
  0x26   :  { %464 = vmatpush.msrb.mxu3 %v276_v34 }
  0x28   :  { %466 = vmatpush.msrb.mxu3 %v278_v39  ;;  %v541_v39 = vsub.f32 %v2950_v26, %v2964_v33 }
  0x2a   :  { %v2987_v44 = vand.u32 4294901760, %v541_v39 }
  0x2c   :  { %543 = vmatpush.msrb.mxu1 %v2987_v44 }
  0x8c   :  { %v77_v50 = vpop.f32.mrf.mxu0 }
  0x8d   :  { %v78_v54 = vadd.f32 %v2735_v51, %v77_v50  ;;  %v2995_v50 = vand.u32 4294901760, %v547_v47 }
  0x8e   :  { %v116_v53 = vpop.f32.mrf.mxu1 }
  0x8f   :  { %v117_v56 = vadd.f32 %v116_v53, %v78_v54  ;;  %549 = vmatpush.msrb.mxu1 %v2995_v50 }
  0x91   :  { %v85_v52 = vpop.f32.mrf.mxu2 }
  0x92   :  { %v120_v55 = vpop.f32.mrf.mxu3  ;;  %v86_v62 = vadd.f32 %v2735_v51, %v85_v52  ;;  %v508_v52 = vsub.f32 %v2982_v42, %v507_v48 }
  0x94   :  { %v209_v58 = vpop.f32.mrf.mxu0  ;;  %v121_v3 = vadd.f32 %v120_v55, %v86_v62  ;;  %v509_v55 = vand.u32 4294901760, %v508_v52 }
  0x96   :  { %v236_v61 = vpop.f32.mrf.mxu1 }
  0x99   :  { %v146_v57 = vpop.f32.mrf.mxu2 }
  0x9a   :  { %v147_v59 = vadd.f32 %v146_v57, %v117_v56  ;;  %v176_v60 = vpop.f32.mrf.mxu3 }
  0x9c   :  { %v177_v63 = vadd.f32 %v176_v60, %v147_v59  ;;  %v213_v13 = vpop.f32.mrf.mxu0 }
  0x9e   :  { %v210_v0 = vadd.f32 %v209_v58, %v177_v63  ;;  %v240_v20 = vpop.f32.mrf.mxu1 }
  0xa0   :  { %v237_v4 = vadd.f32 %v236_v61, %v210_v0  ;;  %v2736_v61 = vld [vmem:[%s3346_s7] ss:$0 sm:$0xff]  ;;  %s2818_s7 = smov 64  }
  0xa1   :  { %v151_v7 = vpop.f32.mrf.mxu2 }
  0xa2   :  { %v243_v8 = vmax.f32 %v237_v4, 0.0  ;;  %v152_v9 = vadd.f32 %v151_v7, %v121_v3  ;;  %v182_v12 = vpop.f32.mrf.mxu3 }
  0xa4   :  { %v255_v15 = vsel %vm253_vm1, %v243_v8, 0  ;;  %v183_v16 = vadd.f32 %v182_v12, %v152_v9 }
  0xa5   :  { %v2936_v19 = vand.u32 4294901760, %v255_v15 }
  0xa6   :  { %v214_v23 = vadd.f32 %v213_v13, %v183_v16 }
  0xa7   :  { %v281_v27 = vsub.f32 %v255_v15, %v2936_v19  ;;  %334 = vmatmul.f32.vlgmr.msra.gmra.mxu3 %v2936_v19 }
  0xa8   :  { %v241_v30 = vadd.f32 %v240_v20, %v214_v23  ;;  %598 = vmatpush.msra.mxu3 %v2915_v5 }
  0xa9   :  { %368 = vmatmul.f32.vlgmr.msra.gmra.mxu0 %v281_v27  ;;  %v282_v34 = vand.u32 4294901760, %v281_v27 }
  0xaa   :  { %v244_v37 = vmax.f32 %v241_v30, 0.0  ;;  %600 = vmatpush.msra.mxu3 %v2917_v6  ;;  %627 = vmatpush.msra.mxu0 %v2931_v17 }
  0xab   :  { %400 = vmatmul.f32.vlgmr.msra.gmra.mxu1 %v282_v34  ;;  %v283_v40 = vsub.f32 %v281_v27, %v282_v34 }
  0xac   :  { %v258_v43 = vsel %vm253_vm1, %v244_v37, 0  ;;  %602 = vmatpush.msra.mxu3 %v2934_v18  ;;  %631 = vmatpush.msra.mxu0 %v2947_v25 }
  0xad   :  { %v288_v45 = vand.u32 4294901760, %v258_v43  ;;  %v284_v46 = vand.u32 4294901760, %v283_v40  ;;  %658 = vmatpush.msra.mxu1 %v2915_v5 }
  0xae   :  { %604 = vmatpush.msra.mxu3 %v2955_v28  ;;  %635 = vmatpush.msra.mxu0 %v2964_v33 }
  0xaf   :  { %285 = vmatmul.f32.vlgmr.msra.gmra.mxu2 %v284_v46  ;;  %338 = vmatmul.f32.gmra.mxu3 %v288_v45  ;;  %v289_v49 = vsub.f32 %v258_v43, %v288_v45 }
  0xb0   :  { %569 = vmatpush.msra.mxu2 %v2920_v10  ;;  %660 = vmatpush.msra.mxu1 %v2917_v6 }
  0xb1   :  { %373 = vmatmul.f32.gmra.mxu0 %v289_v49  ;;  %v290_v51 = vand.u32 4294901760, %v289_v49 }
  0xb2   :  { %572 = vmatpush.msra.mxu2 %v2924_v11  ;;  %639 = vmatpush.msra.mxu0 %v2979_v41 }
  0xb3   :  { %406 = vmatmul.f32.gmra.mxu1 %v290_v51  ;;  %v291_v53 = vsub.f32 %v289_v49, %v290_v51 }
  0xb4   :  { %575 = vmatpush.msra.mxu2 %v2950_v26  ;;  %662 = vmatpush.msra.mxu1 %v2934_v18 }
  0xb5   :  { %v292_v54 = vand.u32 4294901760, %v291_v53 }
  0xb6   :  { %578 = vmatpush.msra.mxu2 %v2967_v35  ;;  %664 = vmatpush.msra.mxu1 %v2955_v28 }
  0xb7   :  { %293 = vmatmul.f32.gmra.mxu2 %v292_v54  ;;  %468 = vmatmul.f32.vlgmr.msrb.gmra.mxu3 %v2936_v19 }
  0xb8   :  { %763 = vmatpush.msrb.mxu3 %v2959_v31 }
  0xb9   :  { %510 = vmatmul.f32.vlgmr.msrb.gmra.mxu0 %v509_v55 }
  0xba   :  { %769 = vmatpush.msrb.mxu3 %v2973_v38  ;;  %801 = vmatpush.msrb.mxu0 %v2920_v10 }
  0xbb   :  { %551 = vmatmul.f32.vlgmr.msrb.gmra.mxu1 %v2969_v36 }
  0xbc   :  { %775 = vmatpush.msrb.mxu3 %v2987_v44  ;;  %804 = vmatpush.msrb.mxu0 %v2924_v11 }
  0xbd   :  { %830 = vmatpush.msrb.mxu1 %v2915_v5 }
  0xbe   :  { %781 = vmatpush.msrb.mxu3 %v2995_v50  ;;  %807 = vmatpush.msrb.mxu0 %v2950_v26 }
  0xbf   :  { %439 = vmatmul.f32.vlgmr.msrb.gmra.mxu2 %v2936_v19  ;;  %472 = vmatmul.f32.gmra.mxu3 %v288_v45 }
  0xc0   :  { %832 = vmatpush.msrb.mxu1 %v2917_v6  ;;  %730 = vmatpush.msrb.mxu2 %v2915_v5 }
  0xc1   :  { %641 = vmatmul.f32.vlgmr.msra.gmra.mxu0 %v2969_v36 }
  0xc2   :  { %810 = vmatpush.msrb.mxu0 %v2967_v35  ;;  %834 = vmatpush.msrb.mxu1 %v2934_v18 }
  0xc3   :  { %666 = vmatmul.f32.vlgmr.msra.gmra.mxu1 %v2969_v36  ;;  %732 = vmatpush.msrb.mxu2 %v2917_v6 }
  0xc4   :  { %836 = vmatpush.msrb.mxu1 %v2955_v28  ;;  %965 = vmatpush.msra.mxu0 %v2915_v5 }
  0xc5   :  { %734 = vmatpush.msrb.mxu2 %v2934_v18 }
  0xc6   :  { %998 = vmatpush.msra.mxu1 %v2959_v31  ;;  %967 = vmatpush.msra.mxu0 %v2917_v6 }
  0xc7   :  { %443 = vmatmul.f32.gmra.mxu2 %v288_v45  ;;  %608 = vmatmul.f32.vlgmr.msra.gmra.mxu3 %v507_v48  ;;  %v481_v45 = vld [vmem:[%s3347_s2] sm:$0x3] }
  0xc8   :  { %890 = vmatpush.msra.mxu3 %v2915_v5  ;;  %736 = vmatpush.msrb.mxu2 %v2955_v28 }
  0xc9   :  { %1004 = vmatpush.msra.mxu1 %v2973_v38  ;;  %969 = vmatpush.msra.mxu0 %v2934_v18 }
  0xca   :  { %892 = vmatpush.msra.mxu3 %v2917_v6 }
  0xcb   :  { %1010 = vmatpush.msra.mxu1 %v2987_v44  ;;  %971 = vmatpush.msra.mxu0 %v2955_v28 }
  0xcc   :  { %894 = vmatpush.msra.mxu3 %v2934_v18 }
  0xcd   :  { %1016 = vmatpush.msra.mxu1 %v2995_v50 }
  0xce   :  { %896 = vmatpush.msra.mxu3 %v2955_v28 }
  0xcf   :  { %581 = vmatmul.f32.vlgmr.msra.gmra.mxu2 %v2982_v42 }
  0xd0   :  { %859 = vmatpush.msra.mxu2 %v2931_v17 }
  0xd2   :  { %863 = vmatpush.msra.mxu2 %v2947_v25 }
  0xd4   :  { %867 = vmatpush.msra.mxu2 %v2964_v33 }
  0xd6   :  { %871 = vmatpush.msra.mxu2 %v2979_v41 }
 0x126   :  { %v369_v58 = vpop.f32.mrf.mxu0 }
 0x128   :  { %v401_v59 = vpop.f32.mrf.mxu1 }
 0x12a   :  { %v335_v56 = vpop.f32.mrf.mxu3 }
 0x12e   :  { %v374_v1 = vpop.f32.mrf.mxu0 }
 0x130   :  { %v407_v3 = vpop.f32.mrf.mxu1 }
 0x132   :  { %v286_v57 = vpop.f32.mrf.mxu2  ;;  %v339_v60 = vpop.f32.mrf.mxu3 }
 0x133   :  { %v287_v9 = vadd.f32 %v2736_v61, %v286_v57 }
 0x135   :  { %v336_v15 = vadd.f32 %v335_v56, %v287_v9 }
 0x136   :  { %v511_v12 = vpop.f32.mrf.mxu0 }
 0x137   :  { %v370_v21 = vadd.f32 %v369_v58, %v336_v15 }
 0x138   :  { %v552_v20 = vpop.f32.mrf.mxu1 }
 0x139   :  { %v553_v22 = vadd.f32 %v552_v20, %v511_v12  ;;  %v402_v27 = vadd.f32 %v401_v59, %v370_v21 }
 0x13a   :  { %v294_v62 = vpop.f32.mrf.mxu2  ;;  %v469_v4 = vpop.f32.mrf.mxu3 }
 0x13b   :  { %v295_v63 = vadd.f32 %v2736_v61, %v294_v62 }
 0x13d   :  { %v340_v0 = vadd.f32 %v339_v60, %v295_v63 }
 0x13e   :  { %v642_v30 = vpop.f32.mrf.mxu0 }
 0x13f   :  { %v375_v2 = vadd.f32 %v374_v1, %v340_v0 }
 0x140   :  { %v667_v36 = vpop.f32.mrf.mxu1 }
 0x141   :  { %v408_v7 = vadd.f32 %v407_v3, %v375_v2 }
 0x142   :  { %v440_v8 = vpop.f32.mrf.mxu2  ;;  %v473_v13 = vpop.f32.mrf.mxu3 }
 0x143   :  { %v441_v32 = vadd.f32 %v440_v8, %v402_v27 }
 0x145   :  { %v3053_v39 = vadd.f32 %v469_v4, %v441_v32 }
 0x14a   :  { %v444_v14 = vpop.f32.mrf.mxu2  ;;  %v609_v24 = vpop.f32.mrf.mxu3 }
 0x14b   :  { %v445_v16 = vadd.f32 %v444_v14, %v408_v7 }
 0x14d   :  { %v3051_v19 = vadd.f32 %v473_v13, %v445_v16 }
 0x152   :  { %v582_v23 = vpop.f32.mrf.mxu2 }
 0x153   :  { %v583_v29 = vadd.f32 %v582_v23, %v553_v22 }
 0x155   :  { %v610_v34 = vadd.f32 %v609_v24, %v583_v29 }
 0x157   :  { %v643_v37 = vadd.f32 %v642_v30, %v610_v34 }
 0x159   :  { %v668_v40 = vadd.f32 %v667_v36, %v643_v37 }
 0x15b   :  { %v670_v42 = vadd.f32 %v668_v40, %v3053_v39 }
 0x15d   :  { %2738 = vtanh.f32 %v670_v42  ;;  %v2717_v46 = vmul.f32 -1.442695, %v670_v42 }
 0x15f   :  { %2740 = vpow2.f32 %v2717_v46 }
 0x163   :  { %v2739_v43 = vpop.eup %2738 }
 0x164   :  { %697 = vrot.lane.b32.xlu0 %v2739_v43, %s2818_s7 }
 0x165   :  { %v2741_v47 = vpop.eup %2740 }
 0x166   :  { %v674_v48 = vadd.f32 1.0, %v2741_v47 }
 0x168   :  { %2742 = vrcp.f32 %v674_v48  ;;  %v686_v55 = vand.u32 2147483648, %v674_v48  ;;  %vm680_vm3 = vweird.f32 %v674_v48  ;;  %v684_v56 = vand.u32 2147483647, %v674_v48 }
 0x16a   :  { %v687_v58 = vor.u32 1.1754944e-38, %v686_v55  ;;  %vm685_vm5 = vcmp.eq.f32.partialorder %v684_v56, 8.507059e+37 }
 0x16c   :  { %692 = vrot.lane.b32.xlu0 %v481_v45, %s2819_s24 }
 0x16e   :  { %v2743_v49 = vpop.eup %2742 }
 0x16f   :  { %v676_v51 = vmul.f32 %v2743_v49, %v674_v48  ;;  %vm681_vm2 = vweird.f32 %v2743_v49 }
 0x170   :  { %vm682_vm4 = vmor %vm680_vm3, %vm681_vm2 }
 0x171   :  { %v677_v52 = vsub.f32 1.0, %v676_v51 }
 0x173   :  { %v678_v53 = vmul.f32 %v2743_v49, %v677_v52 }
 0x175   :  { %v679_v54 = vadd.f32 %v2743_v49, %v678_v53 }
 0x177   :  { %v683_v57 = vsel %vm682_vm4, %v2743_v49, %v679_v54 }
 0x178   :  { %v688_v60 = vsel %vm685_vm5, %v687_v58, %v683_v57  ;;  %vm2356_vm5 = vcmask 1045504  }
 0x1d6   :  { %v698_v59 = vpop.permute.xlu0 %697 }
 0x1d7   :  { %v700_v61 = vmul.f32 %v698_v59, %v688_v60 }
 0x1d9   :  { %702 = vrot.lane.b32.xlu1 %v700_v61, %s2819_s24 }
 0x1de   :  { %v693_v62 = vpop.permute.xlu0 %692 }
 0x1df   :  { %v695_v63 = vmul.f32 %v693_v62, %v688_v60 }
 0x24b   :  { %v703_v0 = vpop.permute.xlu1 %702 }
 0x24c   :  { %v3062_v1 = vadd.f32 %v703_v0, %v695_v63 }
 0x24e   :  { %2744 = vtanh.f32 %v3062_v1  ;;  %v927_v59 = vrot.slane %v3062_v1, 6 }
 0x254   :  { %v2745_v2 = vpop.eup %2744 }
 0x255   :  { %708 = vrot.lane.b32.xlu1 %v2745_v2, %s2818_s7 }
 0x2c7   :  { %v709_v3 = vpop.permute.xlu1 %708 }
 0x2c8   :  { %v3066_v4 = vmul.f32 %v709_v3, %v688_v60 }
 0x2ca   :  { %713 = vrot.lane.b32.xlu2 %v3066_v4, %s2819_s24 }
 0x324   :  { %v714_v7 = vpop.permute.xlu2 %713 }
 0x325   :  { %v715_v8 = vsel %vm253_vm1, %v714_v7, 0 }
 0x326   :  { %v737_v9 = vand.u32 4294901760, %v715_v8 }
 0x328   :  { %v738_v12 = vsub.f32 %v715_v8, %v737_v9  ;;  %783 = vmatmul.f32.vlgmr.msrb.gmra.mxu3 %v737_v9 }
 0x329   :  { %1065 = vmatpush.msrb.mxu3 %v2915_v5 }
 0x32a   :  { %v739_v13 = vand.u32 4294901760, %v738_v12  ;;  %813 = vmatmul.f32.vlgmr.msrb.gmra.mxu0 %v738_v12 }
 0x32b   :  { %1067 = vmatpush.msrb.mxu3 %v2917_v6  ;;  %1094 = vmatpush.msrb.mxu0 %v2931_v17 }
 0x32c   :  { %v740_v14 = vsub.f32 %v738_v12, %v739_v13  ;;  %840 = vmatmul.f32.vlgmr.msrb.gmra.mxu1 %v739_v13 }
 0x32d   :  { %1069 = vmatpush.msrb.mxu3 %v2934_v18  ;;  %1125 = vmatpush.msrb.mxu1 %v2915_v5 }
 0x32e   :  { %v741_v15 = vand.u32 4294901760, %v740_v14  ;;  %1098 = vmatpush.msrb.mxu0 %v2947_v25 }
 0x32f   :  { %1071 = vmatpush.msrb.mxu3 %v2955_v28  ;;  %1127 = vmatpush.msrb.mxu1 %v2917_v6 }
 0x330   :  { %742 = vmatmul.f32.vlgmr.msrb.gmra.mxu2 %v741_v15  ;;  %898 = vmatmul.f32.vlgmr.msra.gmra.mxu3 %v737_v9 }
 0x331   :  { %1036 = vmatpush.msrb.mxu2 %v2920_v10  ;;  %1129 = vmatpush.msrb.mxu1 %v2934_v18 }
 0x332   :  { %1102 = vmatpush.msrb.mxu0 %v2964_v33  ;;  %1233 = vmatpush.msra.mxu3 %v2959_v31 }
 0x333   :  { %1039 = vmatpush.msrb.mxu2 %v2924_v11  ;;  %1131 = vmatpush.msrb.mxu1 %v2955_v28 }
 0x334   :  { %1106 = vmatpush.msrb.mxu0 %v2979_v41  ;;  %1239 = vmatpush.msra.mxu3 %v2973_v38 }
 0x335   :  { %1042 = vmatpush.msrb.mxu2 %v2950_v26 }
 0x336   :  { %1245 = vmatpush.msra.mxu3 %v2987_v44 }
 0x337   :  { %1045 = vmatpush.msrb.mxu2 %v2967_v35 }
 0x338   :  { %873 = vmatmul.f32.vlgmr.msra.gmra.mxu2 %v737_v9  ;;  %1251 = vmatpush.msra.mxu3 %v2995_v50 }
 0x339   :  { %1200 = vmatpush.msra.mxu2 %v2915_v5 }
 0x33b   :  { %1202 = vmatpush.msra.mxu2 %v2917_v6 }
 0x33d   :  { %1204 = vmatpush.msra.mxu2 %v2934_v18 }
 0x33f   :  { %1206 = vmatpush.msra.mxu2 %v2955_v28 }
 0x3a7   :  { %v814_v22 = vpop.f32.mrf.mxu0 }
 0x3a9   :  { %v841_v24 = vpop.f32.mrf.mxu1 }
 0x3ab   :  { %v784_v16 = vpop.f32.mrf.mxu3 }
 0x3b3   :  { %v743_v20 = vpop.f32.mrf.mxu2  ;;  %v899_v32 = vpop.f32.mrf.mxu3 }
 0x3b4   :  { %v785_v21 = vadd.f32 %v784_v16, %v743_v20 }
 0x3b6   :  { %v815_v23 = vadd.f32 %v814_v22, %v785_v21 }
 0x3b8   :  { %v842_v27 = vadd.f32 %v841_v24, %v815_v23 }
 0x3bb   :  { %v874_v29 = vpop.f32.mrf.mxu2 }
 0x3bc   :  { %v875_v30 = vadd.f32 %v874_v29, %v842_v27 }
 0x3be   :  { %v900_v34 = vadd.f32 %v899_v32, %v875_v30 }
 0x3c0   :  { %v903_v36 = vrot.slane %v900_v34, 6 }
 0x3c2   :  { %v905_v37 = vadd.f32 %v903_v36, %v3053_v39 }
 0x3c4   :  { %2746 = vtanh.f32 %v905_v37  ;;  %v2718_v42 = vmul.f32 -1.442695, %v905_v37 }
 0x3c6   :  { %2748 = vpow2.f32 %v2718_v42 }
 0x3ca   :  { %v2747_v40 = vpop.eup %2746 }
 0x3cb   :  { %931 = vrot.lane.b32.xlu2 %v2747_v40, %s2818_s7 }
 0x3cc   :  { %v2749_v43 = vpop.eup %2748 }
 0x3cd   :  { %v909_v45 = vadd.f32 1.0, %v2749_v43 }
 0x3cf   :  { %2750 = vrcp.f32 %v909_v45  ;;  %v921_v52 = vand.u32 2147483648, %v909_v45  ;;  %vm915_vm7 = vweird.f32 %v909_v45  ;;  %v919_v53 = vand.u32 2147483647, %v909_v45 }
 0x3d1   :  { %v922_v55 = vor.u32 1.1754944e-38, %v921_v52  ;;  %vm920_vm9 = vcmp.eq.f32.partialorder %v919_v53, 8.507059e+37 }
 0x3d5   :  { %v2751_v46 = vpop.eup %2750 }
 0x3d6   :  { %v911_v47 = vmul.f32 %v2751_v46, %v909_v45  ;;  %vm916_vm6 = vweird.f32 %v2751_v46 }
 0x3d7   :  { %vm917_vm8 = vmor %vm915_vm7, %vm916_vm6 }
 0x3d8   :  { %v912_v48 = vsub.f32 1.0, %v911_v47 }
 0x3da   :  { %v913_v49 = vmul.f32 %v2751_v46, %v912_v48 }
 0x3dc   :  { %v914_v51 = vadd.f32 %v2751_v46, %v913_v49 }
 0x3de   :  { %v918_v54 = vsel %vm917_vm8, %v2751_v46, %v914_v51 }
 0x3df   :  { %v923_v57 = vsel %vm920_vm9, %v922_v55, %v918_v54 }
 0x3e0   :  { %v929_v60 = vmul.f32 %v927_v59, %v923_v57 }
 0x425   :  { %v932_v56 = vpop.permute.xlu2 %931 }
 0x426   :  { %v934_v58 = vmul.f32 %v932_v56, %v923_v57 }
 0x428   :  { %936 = vrot.lane.b32.xlu0 %v934_v58, %s2819_s24 }
 0x49a   :  { %v937_v61 = vpop.permute.xlu0 %936 }
 0x49b   :  { %v3099_v62 = vadd.f32 %v937_v61, %v929_v60 }
 0x49d   :  { %2752 = vtanh.f32 %v3099_v62  ;;  %v1162_v58 = vrot.slane %v3099_v62, 6 }
 0x4a3   :  { %v2753_v63 = vpop.eup %2752 }
 0x4a4   :  { %942 = vrot.lane.b32.xlu1 %v2753_v63, %s2818_s7 }
 0x516   :  { %v943_v0 = vpop.permute.xlu1 %942 }
 0x517   :  { %v3103_v2 = vmul.f32 %v943_v0, %v923_v57 }
 0x519   :  { %v947_v3 = vrot.slane %v3103_v2, 2 }
 0x51b   :  { %948 = vrot.lane.b32.xlu2 %v947_v3, %s2819_s24 }
 0x575   :  { %v949_v7 = vpop.permute.xlu2 %948 }
 0x576   :  { %v950_v8 = vsel %vm253_vm1, %v949_v7, 0  ;;  %v2353_v7 = vsel %vm2352_vm14, %v3066_v4, %v3103_v2 }
 0x577   :  { %v972_v1 = vand.u32 4294901760, %v950_v8 }
 0x579   :  { %v973_v9 = vsub.f32 %v950_v8, %v972_v1  ;;  %1018 = vmatmul.f32.vlgmr.msra.gmra.mxu1 %v972_v1 }
 0x57a   :  { %1300 = vmatpush.msra.mxu1 %v2915_v5 }
 0x57b   :  { %v974_v12 = vand.u32 4294901760, %v973_v9  ;;  %1048 = vmatmul.f32.vlgmr.msrb.gmra.mxu2 %v973_v9 }
 0x57c   :  { %1302 = vmatpush.msra.mxu1 %v2917_v6  ;;  %1329 = vmatpush.msrb.mxu2 %v2931_v17 }
 0x57d   :  { %v975_v13 = vsub.f32 %v973_v9, %v974_v12  ;;  %1075 = vmatmul.f32.vlgmr.msrb.gmra.mxu3 %v974_v12 }
 0x57e   :  { %1304 = vmatpush.msra.mxu1 %v2934_v18  ;;  %1360 = vmatpush.msrb.mxu3 %v2915_v5 }
 0x57f   :  { %v976_v14 = vand.u32 4294901760, %v975_v13  ;;  %1333 = vmatpush.msrb.mxu2 %v2947_v25 }
 0x580   :  { %1306 = vmatpush.msra.mxu1 %v2955_v28  ;;  %1362 = vmatpush.msrb.mxu3 %v2917_v6 }
 0x581   :  { %977 = vmatmul.f32.vlgmr.msra.gmra.mxu0 %v976_v14  ;;  %1133 = vmatmul.f32.vlgmr.msrb.gmra.mxu1 %v972_v1 }
 0x582   :  { %1271 = vmatpush.msra.mxu0 %v2920_v10  ;;  %1364 = vmatpush.msrb.mxu3 %v2934_v18 }
 0x583   :  { %1337 = vmatpush.msrb.mxu2 %v2964_v33  ;;  %1468 = vmatpush.msrb.mxu1 %v2959_v31 }
 0x584   :  { %1274 = vmatpush.msra.mxu0 %v2924_v11  ;;  %1366 = vmatpush.msrb.mxu3 %v2955_v28 }
 0x585   :  { %1341 = vmatpush.msrb.mxu2 %v2979_v41  ;;  %1474 = vmatpush.msrb.mxu1 %v2973_v38 }
 0x586   :  { %1277 = vmatpush.msra.mxu0 %v2950_v26 }
 0x587   :  { %1480 = vmatpush.msrb.mxu1 %v2987_v44 }
 0x588   :  { %1280 = vmatpush.msra.mxu0 %v2967_v35 }
 0x589   :  { %1108 = vmatmul.f32.vlgmr.msrb.gmra.mxu0 %v972_v1  ;;  %1486 = vmatpush.msrb.mxu1 %v2995_v50 }
 0x58a   :  { %1435 = vmatpush.msrb.mxu0 %v2915_v5 }
 0x58c   :  { %1437 = vmatpush.msrb.mxu0 %v2917_v6 }
 0x58e   :  { %1439 = vmatpush.msrb.mxu0 %v2934_v18 }
 0x590   :  { %1441 = vmatpush.msrb.mxu0 %v2955_v28 }
 0x5f6   :  { %v1019_v15 = vpop.f32.mrf.mxu1 }
 0x5fe   :  { %v978_v16 = vpop.f32.mrf.mxu0  ;;  %v1049_v21 = vpop.f32.mrf.mxu2 }
 0x5ff   :  { %v1020_v20 = vadd.f32 %v1019_v15, %v978_v16  ;;  %v1134_v30 = vpop.f32.mrf.mxu1 }
 0x600   :  { %v1076_v23 = vpop.f32.mrf.mxu3 }
 0x601   :  { %v1050_v22 = vadd.f32 %v1049_v21, %v1020_v20 }
 0x603   :  { %v1077_v24 = vadd.f32 %v1076_v23, %v1050_v22 }
 0x606   :  { %v1109_v27 = vpop.f32.mrf.mxu0 }
 0x607   :  { %v1110_v29 = vadd.f32 %v1109_v27, %v1077_v24 }
 0x609   :  { %v1135_v32 = vadd.f32 %v1134_v30, %v1110_v29 }
 0x60b   :  { %v1138_v34 = vrot.slane %v1135_v32, 4 }
 0x60d   :  { %v1140_v36 = vadd.f32 %v1138_v34, %v3053_v39 }
 0x60f   :  { %2754 = vtanh.f32 %v1140_v36  ;;  %v2719_v40 = vmul.f32 -1.442695, %v1140_v36 }
 0x611   :  { %2756 = vpow2.f32 %v2719_v40 }
 0x615   :  { %v2755_v37 = vpop.eup %2754 }
 0x616   :  { %1166 = vrot.lane.b32.xlu0 %v2755_v37, %s2818_s7 }
 0x617   :  { %v2757_v42 = vpop.eup %2756 }
 0x618   :  { %v1144_v43 = vadd.f32 1.0, %v2757_v42 }
 0x61a   :  { %2758 = vrcp.f32 %v1144_v43  ;;  %v1156_v51 = vand.u32 2147483648, %v1144_v43  ;;  %vm1150_vm11 = vweird.f32 %v1144_v43  ;;  %v1154_v52 = vand.u32 2147483647, %v1144_v43 }
 0x61c   :  { %v1157_v54 = vor.u32 1.1754944e-38, %v1156_v51  ;;  %vm1155_vm13 = vcmp.eq.f32.partialorder %v1154_v52, 8.507059e+37 }
 0x620   :  { %v2759_v45 = vpop.eup %2758 }
 0x621   :  { %v1146_v46 = vmul.f32 %v2759_v45, %v1144_v43  ;;  %vm1151_vm10 = vweird.f32 %v2759_v45 }
 0x622   :  { %vm1152_vm12 = vmor %vm1150_vm11, %vm1151_vm10 }
 0x623   :  { %v1147_v47 = vsub.f32 1.0, %v1146_v46 }
 0x625   :  { %v1148_v48 = vmul.f32 %v2759_v45, %v1147_v47 }
 0x627   :  { %v1149_v49 = vadd.f32 %v2759_v45, %v1148_v48 }
 0x629   :  { %v1153_v53 = vsel %vm1152_vm12, %v2759_v45, %v1149_v49 }
 0x62a   :  { %v1158_v56 = vsel %vm1155_vm13, %v1157_v54, %v1153_v53 }
 0x62b   :  { %v1164_v59 = vmul.f32 %v1162_v58, %v1158_v56 }
 0x688   :  { %v1167_v55 = vpop.permute.xlu0 %1166 }
 0x689   :  { %v1169_v57 = vmul.f32 %v1167_v55, %v1158_v56 }
 0x68b   :  { %1171 = vrot.lane.b32.xlu1 %v1169_v57, %s2819_s24 }
 0x6fd   :  { %v1172_v60 = vpop.permute.xlu1 %1171 }
 0x6fe   :  { %v3136_v61 = vadd.f32 %v1172_v60, %v1164_v59 }
 0x700   :  { %2760 = vtanh.f32 %v3136_v61  ;;  %v1397_v57 = vrot.slane %v3136_v61, 6 }
 0x706   :  { %v2761_v63 = vpop.eup %2760 }
 0x707   :  { %1177 = vrot.lane.b32.xlu2 %v2761_v63, %s2818_s7 }
 0x761   :  { %v1178_v0 = vpop.permute.xlu2 %1177 }
 0x762   :  { %v1180_v3 = vmul.f32 %v1178_v0, %v1158_v56 }
 0x764   :  { %v1182_v8 = vrot.slane %v1180_v3, 4  ;;  %v3144_v62 = vsel %vm2354_vm15, %v2353_v7, %v1180_v3 }
 0x766   :  { %1183 = vrot.lane.b32.xlu0 %v1182_v8, %s2819_s24 }
 0x7d8   :  { %v1184_v1 = vpop.permute.xlu0 %1183 }
 0x7d9   :  { %v1185_v9 = vsel %vm253_vm1, %v1184_v1, 0 }
 0x7da   :  { %v1207_v12 = vand.u32 4294901760, %v1185_v9 }
 0x7dc   :  { %v1208_v13 = vsub.f32 %v1185_v9, %v1207_v12  ;;  %1253 = vmatmul.f32.vlgmr.msra.gmra.mxu3 %v1207_v12 }
 0x7dd   :  { %1535 = vmatpush.msra.mxu3 %v2915_v5 }
 0x7de   :  { %v1209_v14 = vand.u32 4294901760, %v1208_v13  ;;  %1283 = vmatmul.f32.vlgmr.msra.gmra.mxu0 %v1208_v13 }
 0x7df   :  { %1537 = vmatpush.msra.mxu3 %v2917_v6  ;;  %1564 = vmatpush.msra.mxu0 %v2931_v17 }
 0x7e0   :  { %v1210_v4 = vsub.f32 %v1208_v13, %v1209_v14  ;;  %1310 = vmatmul.f32.vlgmr.msra.gmra.mxu1 %v1209_v14 }
 0x7e1   :  { %1539 = vmatpush.msra.mxu3 %v2934_v18  ;;  %1595 = vmatpush.msra.mxu1 %v2915_v5 }
 0x7e2   :  { %v1211_v2 = vand.u32 4294901760, %v1210_v4  ;;  %1568 = vmatpush.msra.mxu0 %v2947_v25 }
 0x7e3   :  { %1541 = vmatpush.msra.mxu3 %v2955_v28  ;;  %1597 = vmatpush.msra.mxu1 %v2917_v6 }
 0x7e4   :  { %1212 = vmatmul.f32.vlgmr.msra.gmra.mxu2 %v1211_v2  ;;  %1368 = vmatmul.f32.vlgmr.msrb.gmra.mxu3 %v1207_v12 }
 0x7e5   :  { %1506 = vmatpush.msra.mxu2 %v2920_v10  ;;  %1599 = vmatpush.msra.mxu1 %v2934_v18 }
 0x7e6   :  { %1572 = vmatpush.msra.mxu0 %v2964_v33  ;;  %1699 = vmatpush.msrb.mxu3 %v2959_v31 }
 0x7e7   :  { %1509 = vmatpush.msra.mxu2 %v2924_v11  ;;  %1601 = vmatpush.msra.mxu1 %v2955_v28 }
 0x7e8   :  { %1576 = vmatpush.msra.mxu0 %v2979_v41  ;;  %1705 = vmatpush.msrb.mxu3 %v2973_v38 }
 0x7e9   :  { %1512 = vmatpush.msra.mxu2 %v2950_v26 }
 0x7ea   :  { %1711 = vmatpush.msrb.mxu3 %v2987_v44 }
 0x7eb   :  { %1515 = vmatpush.msra.mxu2 %v2967_v35 }
 0x7ec   :  { %1343 = vmatmul.f32.vlgmr.msrb.gmra.mxu2 %v1207_v12  ;;  %1717 = vmatpush.msrb.mxu3 %v2995_v50 }
 0x7ed   :  { %1666 = vmatpush.msrb.mxu2 %v2915_v5 }
 0x7ef   :  { %1668 = vmatpush.msrb.mxu2 %v2917_v6 }
 0x7f1   :  { %1670 = vmatpush.msrb.mxu2 %v2934_v18 }
 0x7f3   :  { %1672 = vmatpush.msrb.mxu2 %v2955_v28 }
 0x85b   :  { %v1284_v21 = vpop.f32.mrf.mxu0 }
 0x85d   :  { %v1311_v23 = vpop.f32.mrf.mxu1 }
 0x85f   :  { %v1254_v15 = vpop.f32.mrf.mxu3 }
 0x867   :  { %v1213_v16 = vpop.f32.mrf.mxu2  ;;  %v1369_v30 = vpop.f32.mrf.mxu3 }
 0x868   :  { %v1255_v20 = vadd.f32 %v1254_v15, %v1213_v16 }
 0x86a   :  { %v1285_v22 = vadd.f32 %v1284_v21, %v1255_v20 }
 0x86c   :  { %v1312_v24 = vadd.f32 %v1311_v23, %v1285_v22 }
 0x86f   :  { %v1344_v27 = vpop.f32.mrf.mxu2 }
 0x870   :  { %v1345_v29 = vadd.f32 %v1344_v27, %v1312_v24 }
 0x872   :  { %v1370_v32 = vadd.f32 %v1369_v30, %v1345_v29 }
 0x874   :  { %v1373_v34 = vrot.slane %v1370_v32, 2 }
 0x876   :  { %v1375_v36 = vadd.f32 %v1373_v34, %v3053_v39 }
 0x878   :  { %2762 = vtanh.f32 %v1375_v36  ;;  %v2720_v40 = vmul.f32 -1.442695, %v1375_v36 }
 0x87a   :  { %2764 = vpow2.f32 %v2720_v40 }
 0x87e   :  { %v2763_v37 = vpop.eup %2762 }
 0x87f   :  { %1401 = vrot.lane.b32.xlu1 %v2763_v37, %s2818_s7 }
 0x880   :  { %v2765_v42 = vpop.eup %2764 }
 0x881   :  { %v1379_v43 = vadd.f32 1.0, %v2765_v42 }
 0x883   :  { %2766 = vrcp.f32 %v1379_v43  ;;  %v1391_v51 = vand.u32 2147483648, %v1379_v43  ;;  %vm1385_vm2 = vweird.f32 %v1379_v43  ;;  %v1389_v52 = vand.u32 2147483647, %v1379_v43 }
 0x885   :  { %v1392_v53 = vor.u32 1.1754944e-38, %v1391_v51  ;;  %vm1390_vm4 = vcmp.eq.f32.partialorder %v1389_v52, 8.507059e+37 }
 0x889   :  { %v2767_v45 = vpop.eup %2766 }
 0x88a   :  { %v1381_v46 = vmul.f32 %v2767_v45, %v1379_v43  ;;  %vm1386_vm0 = vweird.f32 %v2767_v45 }
 0x88b   :  { %vm1387_vm3 = vmor %vm1385_vm2, %vm1386_vm0 }
 0x88c   :  { %v1382_v47 = vsub.f32 1.0, %v1381_v46 }
 0x88e   :  { %v1383_v48 = vmul.f32 %v2767_v45, %v1382_v47 }
 0x890   :  { %v1384_v49 = vadd.f32 %v2767_v45, %v1383_v48 }
 0x892   :  { %v1388_v39 = vsel %vm1387_vm3, %v2767_v45, %v1384_v49 }
 0x893   :  { %v1393_v55 = vsel %vm1390_vm4, %v1392_v53, %v1388_v39 }
 0x894   :  { %v1399_v58 = vmul.f32 %v1397_v57, %v1393_v55 }
 0x8f1   :  { %v1402_v54 = vpop.permute.xlu1 %1401 }
 0x8f2   :  { %v1404_v56 = vmul.f32 %v1402_v54, %v1393_v55 }
 0x8f4   :  { %1406 = vrot.lane.b32.xlu2 %v1404_v56, %s2819_s24 }
 0x94e   :  { %v1407_v59 = vpop.permute.xlu2 %1406 }
 0x94f   :  { %v3176_v60 = vadd.f32 %v1407_v59, %v1399_v58 }
 0x951   :  { %2768 = vtanh.f32 %v3176_v60  ;;  %v1629_v54 = vrot.slane %v3176_v60, 6 }
 0x957   :  { %v2769_v63 = vpop.eup %2768 }
 0x958   :  { %1412 = vrot.lane.b32.xlu0 %v2769_v63, %s2818_s7 }
 0x9ca   :  { %v1413_v0 = vpop.permute.xlu0 %1412 }
 0x9cb   :  { %v1415_v3 = vmul.f32 %v1413_v0, %v1393_v55 }
 0x9cd   :  { %v1417_v7 = vrot.slane %v1415_v3, 6  ;;  %v3182_v8 = vsel %vm2356_vm5, %v3144_v62, %v1415_v3 }
 0x9cf   :  { %1418 = vrot.lane.b32.xlu1 %v1417_v7, %s2819_s24 }
 0xa41   :  { %v1419_v61 = vpop.permute.xlu1 %1418 }
 0xa42   :  { %v1420_v1 = vsel %vm253_vm1, %v1419_v61, 0 }
 0xa43   :  { %v1442_v9 = vand.u32 4294901760, %v1420_v1 }
 0xa45   :  { %v1443_v12 = vsub.f32 %v1420_v1, %v1442_v9  ;;  %1488 = vmatmul.f32.vlgmr.msrb.gmra.mxu1 %v1442_v9 }
 0xa46   :  { %1766 = vmatpush.msrb.mxu1 %v2915_v5 }
 0xa47   :  { %v1444_v13 = vand.u32 4294901760, %v1443_v12  ;;  %1518 = vmatmul.f32.vlgmr.msra.gmra.mxu2 %v1443_v12 }
 0xa48   :  { %1768 = vmatpush.msrb.mxu1 %v2917_v6  ;;  %1795 = vmatpush.msra.mxu2 %v2931_v17 }
 0xa49   :  { %v1445_v14 = vsub.f32 %v1443_v12, %v1444_v13  ;;  %1545 = vmatmul.f32.vlgmr.msra.gmra.mxu3 %v1444_v13 }
 0xa4a   :  { %1770 = vmatpush.msrb.mxu1 %v2934_v18  ;;  %1826 = vmatpush.msra.mxu3 %v2915_v5 }
 0xa4b   :  { %v1446_v62 = vand.u32 4294901760, %v1445_v14  ;;  %1799 = vmatpush.msra.mxu2 %v2947_v25 }
 0xa4c   :  { %1772 = vmatpush.msrb.mxu1 %v2955_v28  ;;  %1828 = vmatpush.msra.mxu3 %v2917_v6 }
 0xa4d   :  { %1447 = vmatmul.f32.vlgmr.msrb.gmra.mxu0 %v1446_v62  ;;  %1603 = vmatmul.f32.vlgmr.msra.gmra.mxu1 %v1442_v9 }
 0xa4e   :  { %1737 = vmatpush.msrb.mxu0 %v2920_v10  ;;  %1830 = vmatpush.msra.mxu3 %v2934_v18 }
 0xa4f   :  { %1803 = vmatpush.msra.mxu2 %v2964_v33  ;;  %1934 = vmatpush.msra.mxu1 %v2959_v31 }
 0xa50   :  { %1740 = vmatpush.msrb.mxu0 %v2924_v11  ;;  %1832 = vmatpush.msra.mxu3 %v2955_v28 }
 0xa51   :  { %1807 = vmatpush.msra.mxu2 %v2979_v41  ;;  %1940 = vmatpush.msra.mxu1 %v2973_v38 }
 0xa52   :  { %1743 = vmatpush.msrb.mxu0 %v2950_v26 }
 0xa53   :  { %1946 = vmatpush.msra.mxu1 %v2987_v44 }
 0xa54   :  { %1746 = vmatpush.msrb.mxu0 %v2967_v35 }
 0xa55   :  { %1578 = vmatmul.f32.vlgmr.msra.gmra.mxu0 %v1442_v9  ;;  %1952 = vmatpush.msra.mxu1 %v2995_v50 }
 0xa56   :  { %1901 = vmatpush.msra.mxu0 %v2915_v5 }
 0xa58   :  { %1903 = vmatpush.msra.mxu0 %v2917_v6 }
 0xa5a   :  { %1905 = vmatpush.msra.mxu0 %v2934_v18 }
 0xa5c   :  { %1907 = vmatpush.msra.mxu0 %v2955_v28 }
 0xac2   :  { %v1489_v4 = vpop.f32.mrf.mxu1 }
 0xaca   :  { %v1448_v2 = vpop.f32.mrf.mxu0  ;;  %v1519_v16 = vpop.f32.mrf.mxu2 }
 0xacb   :  { %v1490_v15 = vadd.f32 %v1489_v4, %v1448_v2  ;;  %v1604_v27 = vpop.f32.mrf.mxu1 }
 0xacc   :  { %v1546_v21 = vpop.f32.mrf.mxu3 }
 0xacd   :  { %v1520_v20 = vadd.f32 %v1519_v16, %v1490_v15 }
 0xacf   :  { %v1547_v22 = vadd.f32 %v1546_v21, %v1520_v20 }
 0xad2   :  { %v1579_v23 = vpop.f32.mrf.mxu0 }
 0xad3   :  { %v1580_v24 = vadd.f32 %v1579_v23, %v1547_v22 }
 0xad5   :  { %v1605_v29 = vadd.f32 %v1604_v27, %v1580_v24 }
 0xad7   :  { %v1607_v30 = vadd.f32 %v1605_v29, %v3051_v19 }
 0xad9   :  { %2770 = vtanh.f32 %v1607_v30  ;;  %v2721_v34 = vmul.f32 -1.442695, %v1607_v30 }
 0xadb   :  { %2772 = vpow2.f32 %v2721_v34 }
 0xadf   :  { %v2771_v32 = vpop.eup %2770 }
 0xae0   :  { %1633 = vrot.lane.b32.xlu2 %v2771_v32, %s2818_s7 }
 0xae1   :  { %v2773_v36 = vpop.eup %2772 }
 0xae2   :  { %v1611_v37 = vadd.f32 1.0, %v2773_v36 }
 0xae4   :  { %2774 = vrcp.f32 %v1611_v37  ;;  %v1623_v47 = vand.u32 2147483648, %v1611_v37  ;;  %vm1617_vm7 = vweird.f32 %v1611_v37  ;;  %v1621_v48 = vand.u32 2147483647, %v1611_v37 }
 0xae6   :  { %v1624_v51 = vor.u32 1.1754944e-38, %v1623_v47  ;;  %vm1622_vm9 = vcmp.eq.f32.partialorder %v1621_v48, 8.507059e+37 }
 0xaea   :  { %v2775_v40 = vpop.eup %2774 }
 0xaeb   :  { %v1613_v42 = vmul.f32 %v2775_v40, %v1611_v37  ;;  %vm1618_vm6 = vweird.f32 %v2775_v40 }
 0xaec   :  { %vm1619_vm8 = vmor %vm1617_vm7, %vm1618_vm6 }
 0xaed   :  { %v1614_v43 = vsub.f32 1.0, %v1613_v42 }
 0xaef   :  { %v1615_v45 = vmul.f32 %v2775_v40, %v1614_v43 }
 0xaf1   :  { %v1616_v46 = vadd.f32 %v2775_v40, %v1615_v45 }
 0xaf3   :  { %v1620_v49 = vsel %vm1619_vm8, %v2775_v40, %v1616_v46 }
 0xaf4   :  { %v1625_v39 = vsel %vm1622_vm9, %v1624_v51, %v1620_v49 }
 0xaf5   :  { %v1631_v55 = vmul.f32 %v1629_v54, %v1625_v39 }
 0xb3a   :  { %v1634_v52 = vpop.permute.xlu2 %1633 }
 0xb3b   :  { %v1636_v53 = vmul.f32 %v1634_v52, %v1625_v39 }
 0xb3d   :  { %1638 = vrot.lane.b32.xlu0 %v1636_v53, %s2819_s24 }
 0xbaf   :  { %v1639_v56 = vpop.permute.xlu0 %1638 }
 0xbb0   :  { %v3214_v57 = vadd.f32 %v1639_v56, %v1631_v55 }
 0xbb2   :  { %2776 = vtanh.f32 %v3214_v57  ;;  %v1863_v47 = vrot.slane %v3214_v57, 6 }
 0xbb8   :  { %v2777_v58 = vpop.eup %2776 }
 0xbb9   :  { %1644 = vrot.lane.b32.xlu1 %v2777_v58, %s2818_s7 }
 0xc2b   :  { %v1645_v59 = vpop.permute.xlu1 %1644 }
 0xc2c   :  { %v3218_v63 = vmul.f32 %v1645_v59, %v1625_v39 }
 0xc2e   :  { %1649 = vrot.lane.b32.xlu2 %v3218_v63, %s2819_s24 }
 0xc88   :  { %v1650_v0 = vpop.permute.xlu2 %1649 }
 0xc89   :  { %v1651_v3 = vsel %vm253_vm1, %v1650_v0, 0 }
 0xc8a   :  { %v1673_v7 = vand.u32 4294901760, %v1651_v3 }
 0xc8c   :  { %v1674_v60 = vsub.f32 %v1651_v3, %v1673_v7  ;;  %1719 = vmatmul.f32.vlgmr.msrb.gmra.mxu3 %v1673_v7 }
 0xc8d   :  { %2001 = vmatpush.msrb.mxu3 %v2915_v5 }
 0xc8e   :  { %v1675_v61 = vand.u32 4294901760, %v1674_v60  ;;  %1749 = vmatmul.f32.vlgmr.msrb.gmra.mxu0 %v1674_v60 }
 0xc8f   :  { %2003 = vmatpush.msrb.mxu3 %v2917_v6  ;;  %2030 = vmatpush.msrb.mxu0 %v2931_v17 }
 0xc90   :  { %v1676_v1 = vsub.f32 %v1674_v60, %v1675_v61  ;;  %1776 = vmatmul.f32.vlgmr.msrb.gmra.mxu1 %v1675_v61 }
 0xc91   :  { %2005 = vmatpush.msrb.mxu3 %v2934_v18  ;;  %2061 = vmatpush.msrb.mxu1 %v2915_v5 }
 0xc92   :  { %v1677_v9 = vand.u32 4294901760, %v1676_v1  ;;  %2034 = vmatpush.msrb.mxu0 %v2947_v25 }
 0xc93   :  { %2007 = vmatpush.msrb.mxu3 %v2955_v28  ;;  %2063 = vmatpush.msrb.mxu1 %v2917_v6 }
 0xc94   :  { %1678 = vmatmul.f32.vlgmr.msrb.gmra.mxu2 %v1677_v9  ;;  %1834 = vmatmul.f32.vlgmr.msra.gmra.mxu3 %v1673_v7 }
 0xc95   :  { %1972 = vmatpush.msrb.mxu2 %v2920_v10  ;;  %2065 = vmatpush.msrb.mxu1 %v2934_v18 }
 0xc96   :  { %2038 = vmatpush.msrb.mxu0 %v2964_v33  ;;  %2169 = vmatpush.msra.mxu3 %v2959_v31 }
 0xc97   :  { %1975 = vmatpush.msrb.mxu2 %v2924_v11  ;;  %2067 = vmatpush.msrb.mxu1 %v2955_v28 }
 0xc98   :  { %2042 = vmatpush.msrb.mxu0 %v2979_v41  ;;  %2175 = vmatpush.msra.mxu3 %v2973_v38 }
 0xc99   :  { %1978 = vmatpush.msrb.mxu2 %v2950_v26 }
 0xc9a   :  { %2181 = vmatpush.msra.mxu3 %v2987_v44 }
 0xc9b   :  { %1981 = vmatpush.msrb.mxu2 %v2967_v35 }
 0xc9c   :  { %1809 = vmatmul.f32.vlgmr.msra.gmra.mxu2 %v1673_v7  ;;  %2187 = vmatpush.msra.mxu3 %v2995_v50 }
 0xc9d   :  { %2136 = vmatpush.msra.mxu2 %v2915_v5 }
 0xc9f   :  { %2138 = vmatpush.msra.mxu2 %v2917_v6 }
 0xca1   :  { %2140 = vmatpush.msra.mxu2 %v2934_v18 }
 0xca3   :  { %2142 = vmatpush.msra.mxu2 %v2955_v28 }
 0xd0b   :  { %v1750_v13 = vpop.f32.mrf.mxu0 }
 0xd0d   :  { %v1777_v62 = vpop.f32.mrf.mxu1 }
 0xd0f   :  { %v1720_v31 = vpop.f32.mrf.mxu3 }
 0xd17   :  { %v1679_v12 = vpop.f32.mrf.mxu2  ;;  %v1835_v15 = vpop.f32.mrf.mxu3 }
 0xd18   :  { %v1721_v38 = vadd.f32 %v1720_v31, %v1679_v12 }
 0xd1a   :  { %v1751_v14 = vadd.f32 %v1750_v13, %v1721_v38 }
 0xd1c   :  { %v1778_v44 = vadd.f32 %v1777_v62, %v1751_v14 }
 0xd1f   :  { %v1810_v4 = vpop.f32.mrf.mxu2 }
 0xd20   :  { %v1811_v2 = vadd.f32 %v1810_v4, %v1778_v44 }
 0xd22   :  { %v1836_v16 = vadd.f32 %v1835_v15, %v1811_v2 }
 0xd24   :  { %v1839_v50 = vrot.slane %v1836_v16, 6 }
 0xd26   :  { %v1841_v20 = vadd.f32 %v1839_v50, %v3051_v19 }
 0xd28   :  { %2778 = vtanh.f32 %v1841_v20  ;;  %v2722_v22 = vmul.f32 -1.442695, %v1841_v20 }
 0xd2a   :  { %2780 = vpow2.f32 %v2722_v22 }
 0xd2e   :  { %v2779_v21 = vpop.eup %2778 }
 0xd2f   :  { %1867 = vrot.lane.b32.xlu0 %v2779_v21, %s2818_s7 }
 0xd30   :  { %v2781_v23 = vpop.eup %2780 }
 0xd31   :  { %v1845_v24 = vadd.f32 1.0, %v2781_v23 }
 0xd33   :  { %2782 = vrcp.f32 %v1845_v24  ;;  %v1857_v36 = vand.u32 2147483648, %v1845_v24  ;;  %vm1851_vm11 = vweird.f32 %v1845_v24  ;;  %v1855_v37 = vand.u32 2147483647, %v1845_v24 }
 0xd35   :  { %v1858_v42 = vor.u32 1.1754944e-38, %v1857_v36  ;;  %vm1856_vm13 = vcmp.eq.f32.partialorder %v1855_v37, 8.507059e+37 }
 0xd39   :  { %v2783_v27 = vpop.eup %2782 }
 0xd3a   :  { %v1847_v29 = vmul.f32 %v2783_v27, %v1845_v24  ;;  %vm1852_vm10 = vweird.f32 %v2783_v27 }
 0xd3b   :  { %vm1853_vm12 = vmor %vm1851_vm11, %vm1852_vm10 }
 0xd3c   :  { %v1848_v30 = vsub.f32 1.0, %v1847_v29 }
 0xd3e   :  { %v1849_v32 = vmul.f32 %v2783_v27, %v1848_v30 }
 0xd40   :  { %v1850_v34 = vadd.f32 %v2783_v27, %v1849_v32 }
 0xd42   :  { %v1854_v40 = vsel %vm1853_vm12, %v2783_v27, %v1850_v34 }
 0xd43   :  { %v1859_v45 = vsel %vm1856_vm13, %v1858_v42, %v1854_v40 }
 0xd44   :  { %v1865_v48 = vmul.f32 %v1863_v47, %v1859_v45 }
 0xda1   :  { %v1868_v43 = vpop.permute.xlu0 %1867 }
 0xda2   :  { %v1870_v46 = vmul.f32 %v1868_v43, %v1859_v45 }
 0xda4   :  { %1872 = vrot.lane.b32.xlu1 %v1870_v46, %s2819_s24 }
 0xe16   :  { %v1873_v49 = vpop.permute.xlu1 %1872 }
 0xe17   :  { %v3251_v51 = vadd.f32 %v1873_v49, %v1865_v48 }
 0xe19   :  { %2784 = vtanh.f32 %v3251_v51  ;;  %v2098_v20 = vrot.slane %v3251_v51, 6 }
 0xe1f   :  { %v2785_v52 = vpop.eup %2784 }
 0xe20   :  { %1878 = vrot.lane.b32.xlu2 %v2785_v52, %s2818_s7 }
 0xe7a   :  { %v1879_v39 = vpop.permute.xlu2 %1878 }
 0xe7b   :  { %v3255_v53 = vmul.f32 %v1879_v39, %v1859_v45 }
 0xe7d   :  { %v1883_v54 = vrot.slane %v3255_v53, 2  ;;  %v2358_v30 = vsel %vm2352_vm14, %v3218_v63, %v3255_v53 }
 0xe7f   :  { %1884 = vrot.lane.b32.xlu0 %v1883_v54, %s2819_s24 }
 0xef1   :  { %v1885_v55 = vpop.permute.xlu0 %1884 }
 0xef2   :  { %v1886_v56 = vsel %vm253_vm1, %v1885_v55, 0 }
 0xef3   :  { %v1908_v57 = vand.u32 4294901760, %v1886_v56 }
 0xef5   :  { %v1909_v58 = vsub.f32 %v1886_v56, %v1908_v57  ;;  %1954 = vmatmul.f32.vlgmr.msra.gmra.mxu1 %v1908_v57 }
 0xef6   :  { %2236 = vmatpush.msra.mxu1 %v2915_v5 }
 0xef7   :  { %v1910_v59 = vand.u32 4294901760, %v1909_v58  ;;  %1984 = vmatmul.f32.vlgmr.msrb.gmra.mxu2 %v1909_v58 }
 0xef8   :  { %2238 = vmatpush.msra.mxu1 %v2917_v6  ;;  %2265 = vmatpush.msrb.mxu2 %v2931_v17 }
 0xef9   :  { %v1911_v0 = vsub.f32 %v1909_v58, %v1910_v59  ;;  %2011 = vmatmul.f32.vlgmr.msrb.gmra.mxu3 %v1910_v59 }
 0xefa   :  { %2240 = vmatpush.msra.mxu1 %v2934_v18  ;;  %2296 = vmatpush.msrb.mxu3 %v2915_v5 }
 0xefb   :  { %v1912_v3 = vand.u32 4294901760, %v1911_v0  ;;  %2269 = vmatpush.msrb.mxu2 %v2947_v25 }
 0xefc   :  { %2242 = vmatpush.msra.mxu1 %v2955_v28  ;;  %2298 = vmatpush.msrb.mxu3 %v2917_v6 }
 0xefd   :  { %1913 = vmatmul.f32.vlgmr.msra.gmra.mxu0 %v1912_v3  ;;  %2069 = vmatmul.f32.vlgmr.msrb.gmra.mxu1 %v1908_v57  ;;  %v2364_v3 = vld [vmem:[%s3348_s9 + $0x18] sm:$0xff] }
 0xefe   :  { %2207 = vmatpush.msra.mxu0 %v2920_v10  ;;  %2300 = vmatpush.msrb.mxu3 %v2934_v18 }
 0xeff   :  { %2273 = vmatpush.msrb.mxu2 %v2964_v33 }
 0xf00   :  { %2210 = vmatpush.msra.mxu0 %v2924_v11  ;;  %2302 = vmatpush.msrb.mxu3 %v2955_v28 }
 0xf01   :  { %2277 = vmatpush.msrb.mxu2 %v2979_v41 }
 0xf02   :  { %2213 = vmatpush.msra.mxu0 %v2950_v26 }
 0xf04   :  { %2216 = vmatpush.msra.mxu0 %v2967_v35 }
 0xf05   :  { %2044 = vmatmul.f32.vlgmr.msrb.gmra.mxu0 %v1908_v57 }
 0xf72   :  { %v1955_v5 = vpop.f32.mrf.mxu1 }
 0xf7a   :  { %v1914_v6 = vpop.f32.mrf.mxu0  ;;  %v1985_v25 = vpop.f32.mrf.mxu2 }
 0xf7b   :  { %v1956_v17 = vadd.f32 %v1955_v5, %v1914_v6  ;;  %v2070_v61 = vpop.f32.mrf.mxu1  ;;  %v2391_v6 = vand.u32 4294901760, %v2364_v3 }
 0xf7c   :  { %v2012_v7 = vpop.f32.mrf.mxu3 }
 0xf7d   :  { %v1986_v10 = vadd.f32 %v1985_v25, %v1956_v17  ;;  %v2363_v17 = vld [vmem:[%s3348_s9 + $0x10] sm:$0xff]  ;;  %2392 = vmatpush.msrb.mxu0 %v2391_v6 }
 0xf7e   :  { %v2393_v25 = vand.u32 4294901760, %v2363_v17 }
 0xf7f   :  { %v2013_v18 = vadd.f32 %v2012_v7, %v1986_v10 }
 0xf80   :  { %2394 = vmatpush.msrb.mxu0 %v2393_v25 }
 0xf82   :  { %v2045_v60 = vpop.f32.mrf.mxu0 }
 0xf83   :  { %v2046_v33 = vadd.f32 %v2045_v60, %v2013_v18  ;;  %v2435_v18 = vsub.f32 %v2363_v17, %v2393_v25 }
 0xf85   :  { %v2071_v11 = vadd.f32 %v2070_v61, %v2046_v33  ;;  %v2361_v33 = vld [vmem:[%s3348_s9] sm:$0xff] }
 0xf87   :  { %v2074_v1 = vrot.slane %v2071_v11, 4  ;;  %v2436_v11 = vand.u32 4294901760, %v2435_v18 }
 0xf89   :  { %v2076_v28 = vadd.f32 %v2074_v1, %v3051_v19 }
 0xf8b   :  { %2786 = vtanh.f32 %v2076_v28  ;;  %v2723_v26 = vmul.f32 -1.442695, %v2076_v28  ;;  %v2397_v28 = vand.u32 4294901760, %v2361_v33 }
 0xf8d   :  { %2788 = vpow2.f32 %v2723_v26  ;;  %v2437_v26 = vsub.f32 %v2435_v18, %v2436_v11 }
 0xf91   :  { %v2787_v41 = vpop.eup %2786 }
 0xf92   :  { %2102 = vrot.lane.b32.xlu1 %v2787_v41, %s2818_s7 }
 0xf93   :  { %v2789_v35 = vpop.eup %2788 }
 0xf94   :  { %v2080_v9 = vadd.f32 1.0, %v2789_v35 }
 0xf96   :  { %2790 = vrcp.f32 %v2080_v9  ;;  %v2092_v62 = vand.u32 2147483648, %v2080_v9  ;;  %vm2086_vm2 = vweird.f32 %v2080_v9  ;;  %v2090_v44 = vand.u32 2147483647, %v2080_v9 }
 0xf98   :  { %v2093_v2 = vor.u32 1.1754944e-38, %v2092_v62  ;;  %vm2091_vm4 = vcmp.eq.f32.partialorder %v2090_v44, 8.507059e+37 }
 0xf9c   :  { %v2791_v31 = vpop.eup %2790 }
 0xf9d   :  { %v2082_v12 = vmul.f32 %v2791_v31, %v2080_v9  ;;  %vm2087_vm0 = vweird.f32 %v2791_v31  ;;  %v2447_v9 = vsub.f32 %v2361_v33, %v2397_v28 }
 0xf9e   :  { %vm2088_vm3 = vmor %vm2086_vm2, %vm2087_vm0  ;;  %vm2707_vm0 = vcmask 31744   ;;  %vm2710_vm2 = vcmask 64512  }
 0xf9f   :  { %v2083_v38 = vsub.f32 1.0, %v2082_v12 }
 0xfa1   :  { %v2084_v13 = vmul.f32 %v2791_v31, %v2083_v38  ;;  %v2448_v38 = vand.u32 4294901760, %v2447_v9 }
 0xfa3   :  { %v2085_v14 = vadd.f32 %v2791_v31, %v2084_v13 }
 0xfa5   :  { %v2089_v4 = vsel %vm2088_vm3, %v2791_v31, %v2085_v14  ;;  %v2438_v31 = vand.u32 4294901760, %v2437_v26  ;;  %v2449_v14 = vsub.f32 %v2447_v9, %v2448_v38 }
 0xfa6   :  { %v2094_v16 = vsel %vm2091_vm4, %v2093_v2, %v2089_v4 }
 0xfa7   :  { %v2100_v21 = vmul.f32 %v2098_v20, %v2094_v16  ;;  %v2450_v44 = vand.u32 4294901760, %v2449_v14 }
0x1004   :  { %v2103_v15 = vpop.permute.xlu1 %2102 }
0x1005   :  { %v2105_v50 = vmul.f32 %v2103_v15, %v2094_v16 }
0x1007   :  { %2107 = vrot.lane.b32.xlu2 %v2105_v50, %s2819_s24 }
0x1061   :  { %v2108_v22 = vpop.permute.xlu2 %2107 }
0x1062   :  { %v3280_v23 = vadd.f32 %v2108_v22, %v2100_v21 }
0x1064   :  { %2792 = vtanh.f32 %v3280_v23 }
0x106a   :  { %v2793_v24 = vpop.eup %2792 }
0x106b   :  { %2113 = vrot.lane.b32.xlu0 %v2793_v24, %s2818_s7 }
0x10dd   :  { %v2114_v27 = vpop.permute.xlu0 %2113 }
0x10de   :  { %v2116_v29 = vmul.f32 %v2114_v27, %v2094_v16 }
0x10e0   :  { %v2118_v32 = vrot.slane %v2116_v29, 4  ;;  %v3288_v34 = vsel %vm2354_vm15, %v2358_v30, %v2116_v29 }
0x10e2   :  { %2119 = vrot.lane.b32.xlu1 %v2118_v32, %s2819_s24 }
0x1154   :  { %v2120_v36 = vpop.permute.xlu1 %2119 }
0x1155   :  { %v2121_v37 = vsel %vm253_vm1, %v2120_v36, 0 }
0x1156   :  { %v2143_v40 = vand.u32 4294901760, %v2121_v37 }
0x1158   :  { %v2144_v42 = vsub.f32 %v2121_v37, %v2143_v40  ;;  %2189 = vmatmul.f32.vlgmr.msra.gmra.mxu3 %v2143_v40 }
0x1159   :  { %2509 = vmatpush.msra.mxu3 %v2391_v6 }
0x115a   :  { %v2145_v43 = vand.u32 4294901760, %v2144_v42  ;;  %2219 = vmatmul.f32.vlgmr.msra.gmra.mxu0 %v2144_v42 }
0x115b   :  { %2511 = vmatpush.msra.mxu3 %v2393_v25 }
0x115c   :  { %v2146_v45 = vsub.f32 %v2144_v42, %v2145_v43  ;;  %2246 = vmatmul.f32.vlgmr.msra.gmra.mxu1 %v2145_v43 }
0x115e   :  { %v2147_v46 = vand.u32 4294901760, %v2146_v45  ;;  %v2333_v45 = vrot.slane %v3280_v23, 6  ;;  %v2604_v23 = vld [vmem:[%s3350_s3 + $0x8] sm:$0xff] }
0x1160   :  { %2148 = vmatmul.f32.vlgmr.msra.gmra.mxu2 %v2147_v46  ;;  %2304 = vmatmul.f32.vlgmr.msrb.gmra.mxu3 %v2143_v40 }
0x1168   :  { %2279 = vmatmul.f32.vlgmr.msrb.gmra.mxu2 %v2143_v40 }
0x11d7   :  { %v2220_v49 = vpop.f32.mrf.mxu0 }
0x11d9   :  { %v2247_v52 = vpop.f32.mrf.mxu1 }
0x11db   :  { %v2190_v63 = vpop.f32.mrf.mxu3 }
0x11e3   :  { %v2149_v47 = vpop.f32.mrf.mxu2  ;;  %v2305_v55 = vpop.f32.mrf.mxu3 }
0x11e4   :  { %v2191_v48 = vadd.f32 %v2190_v63, %v2149_v47 }
0x11e6   :  { %v2221_v51 = vadd.f32 %v2220_v49, %v2191_v48 }
0x11e8   :  { %v2248_v39 = vadd.f32 %v2247_v52, %v2221_v51 }
0x11eb   :  { %v2280_v53 = vpop.f32.mrf.mxu2 }
0x11ec   :  { %v2281_v54 = vadd.f32 %v2280_v53, %v2248_v39  ;;  %v2603_v39 = vld [vmem:[%s3350_s3] sm:$0xff] }
0x11ee   :  { %v2306_v56 = vadd.f32 %v2305_v55, %v2281_v54 }
0x11f0   :  { %v2309_v57 = vrot.slane %v2306_v56, 2 }
0x11f2   :  { %v2311_v58 = vadd.f32 %v2309_v57, %v3051_v19  ;;  %v2429_v19 = vsub.f32 %v2364_v3, %v2391_v6 }
0x11f4   :  { %2794 = vtanh.f32 %v2311_v58  ;;  %v2724_v0 = vmul.f32 -1.442695, %v2311_v58  ;;  %v2430_v7 = vand.u32 4294901760, %v2429_v19  ;;  %2475 = vmatpush.msra.mxu2 %v2429_v19 }
0x11f6   :  { %2796 = vpow2.f32 %v2724_v0  ;;  %v2431_v61 = vsub.f32 %v2429_v19, %v2430_v7  ;;  %2478 = vmatpush.msra.mxu2 %v2435_v18  ;;  %v2737_v0 = vld [vmem:[%s3349_s10] ss:$0 sm:$0xff]  ;;  %s2821_s10 = smov 124  }
0x11f8   :  { %v2432_v41 = vand.u32 4294901760, %v2431_v61 }
0x11fa   :  { %v2795_v59 = vpop.eup %2794  ;;  %2433 = vmatpush.msrb.mxu1 %v2432_v41 }
0x11fb   :  { %2337 = vrot.lane.b32.xlu2 %v2795_v59, %s2818_s7 }
0x11fc   :  { %v2797_v5 = vpop.eup %2796  ;;  %2439 = vmatpush.msrb.mxu1 %v2438_v31 }
0x11fd   :  { %v2315_v10 = vadd.f32 1.0, %v2797_v5 }
0x11ff   :  { %2798 = vrcp.f32 %v2315_v10  ;;  %v2327_v50 = vand.u32 2147483648, %v2315_v10  ;;  %vm2321_vm15 = vweird.f32 %v2315_v10  ;;  %v2325_v20 = vand.u32 2147483647, %v2315_v10 }
0x1201   :  { %v2328_v22 = vor.u32 1.1754944e-38, %v2327_v50  ;;  %vm2326_vm7 = vcmp.eq.f32.partialorder %v2325_v20, 8.507059e+37 }
0x1203   :  { %2371 = vrot.lane.b32.xlu2 %v3182_v8, %s2819_s24  ;;  %v2362_v8 = vld [vmem:[%s3348_s9 + $0x8] sm:$0xff] }
0x1204   :  { %v2395_v60 = vand.u32 4294901760, %v2362_v8 }
0x1205   :  { %v2799_v62 = vpop.eup %2798 }
0x1206   :  { %v2441_v1 = vsub.f32 %v2362_v8, %v2395_v60  ;;  %2513 = vmatpush.msra.mxu3 %v2395_v60  ;;  %2396 = vmatpush.msrb.mxu0 %v2395_v60  ;;  %v2317_v4 = vmul.f32 %v2799_v62, %v2315_v10  ;;  %vm2322_vm14 = vweird.f32 %v2799_v62 }
0x1207   :  { %vm2323_vm6 = vmor %vm2321_vm15, %vm2322_vm14 }
0x1208   :  { %v2442_v35 = vand.u32 4294901760, %v2441_v1  ;;  %2481 = vmatpush.msra.mxu2 %v2441_v1  ;;  %2515 = vmatpush.msra.mxu3 %v2397_v28  ;;  %v2318_v2 = vsub.f32 1.0, %v2317_v4 }
0x1209   :  { %2398 = vmatpush.msrb.mxu0 %v2397_v28 }
0x120a   :  { %v2443_v12 = vsub.f32 %v2441_v1, %v2442_v35  ;;  %2484 = vmatpush.msra.mxu2 %v2447_v9  ;;  %v2319_v15 = vmul.f32 %v2799_v62, %v2318_v2 }
0x120b   :  { %2544 = vmatpush.msra.mxu0 %v2430_v7  ;;  %2609 = vrot.lane.b32.xlu2 %v2604_v23, %s2820_s13 }
0x120c   :  { %v2444_v13 = vand.u32 4294901760, %v2443_v12  ;;  %v2320_v16 = vadd.f32 %v2799_v62, %v2319_v15 }
0x120d   :  { %2548 = vmatpush.msra.mxu0 %v2436_v11 }
0x120e   :  { %2445 = vmatpush.msrb.mxu1 %v2444_v13  ;;  %v2324_v21 = vsel %vm2323_vm6, %v2799_v62, %v2320_v16 }
0x120f   :  { %2552 = vmatpush.msra.mxu0 %v2442_v35  ;;  %v2329_v27 = vsel %vm2326_vm7, %v2328_v22, %v2324_v21 }
0x1210   :  { %2451 = vmatpush.msrb.mxu1 %v2450_v44  ;;  %v2335_v46 = vmul.f32 %v2333_v45, %v2329_v27 }
0x1211   :  { %2556 = vmatpush.msra.mxu0 %v2448_v38 }
0x1212   :  { %2579 = vmatpush.msra.mxu1 %v2391_v6 }
0x1214   :  { %2581 = vmatpush.msra.mxu1 %v2393_v25 }
0x1216   :  { %2583 = vmatpush.msra.mxu1 %v2395_v60 }
0x1218   :  { %2585 = vmatpush.msra.mxu1 %v2397_v28 }
0x1255   :  { %v2338_v24 = vpop.permute.xlu2 %2337 }
0x1256   :  { %v2340_v29 = vmul.f32 %v2338_v24, %v2329_v27 }
0x1258   :  { %2342 = vrot.lane.b32.xlu0 %v2340_v29, %s2819_s24 }
0x125d   :  { %v2372_v30 = vpop.permute.xlu2 %2371 }
0x125e   :  { %v2375_v32 = vsel %vm253_vm1, %v2372_v30, 0 }
0x125f   :  { %v2399_v36 = vand.u32 4294901760, %v2375_v32 }
0x1261   :  { %v2400_v37 = vsub.f32 %v2375_v32, %v2399_v36  ;;  %2453 = vmatmul.f32.vlgmr.msrb.gmra.mxu1 %v2399_v36 }
0x1263   :  { %v2401_v40 = vand.u32 4294901760, %v2400_v37  ;;  %2487 = vmatmul.f32.vlgmr.msra.gmra.mxu2 %v2400_v37 }
0x1265   :  { %v2402_v42 = vsub.f32 %v2400_v37, %v2401_v40  ;;  %2519 = vmatmul.f32.vlgmr.msra.gmra.mxu3 %v2401_v40  ;;  %v2610_v22 = vpop.permute.xlu2 %2609 }
0x1267   :  { %v2403_v43 = vand.u32 4294901760, %v2402_v42 }
0x1269   :  { %2404 = vmatmul.f32.vlgmr.msrb.gmra.mxu0 %v2403_v43 }
0x12ca   :  { %v2343_v63 = vpop.permute.xlu0 %2342 }
0x12cb   :  { %v2345_v47 = vadd.f32 %v2343_v63, %v2335_v46 }
0x12cd   :  { %2800 = vtanh.f32 %v2345_v47 }
0x12d3   :  { %v2801_v48 = vpop.eup %2800 }
0x12d4   :  { %2348 = vrot.lane.b32.xlu1 %v2801_v48, %s2818_s7 }
0x12dc   :  { %2607 = vrot.lane.b32.xlu1 %v2603_v39, %s2820_s13 }
0x12de   :  { %v2454_v59 = vpop.f32.mrf.mxu1 }
0x12e6   :  { %v2405_v3 = vpop.f32.mrf.mxu0  ;;  %v2488_v25 = vpop.f32.mrf.mxu2 }
0x12e7   :  { %v2406_v5 = vadd.f32 %v2737_v0, %v2405_v3 }
0x12e8   :  { %v2520_v7 = vpop.f32.mrf.mxu3 }
0x12e9   :  { %v2455_v17 = vadd.f32 %v2454_v59, %v2406_v5 }
0x12eb   :  { %v2489_v10 = vadd.f32 %v2488_v25, %v2455_v17 }
0x12ed   :  { %v2521_v18 = vadd.f32 %v2520_v7, %v2489_v10 }
0x1346   :  { %v2349_v49 = vpop.permute.xlu1 %2348 }
0x1347   :  { %v2351_v51 = vmul.f32 %v2349_v49, %v2329_v27 }
0x1349   :  { %v2360_v52 = vsel %vm2356_vm5, %v3288_v34, %v2351_v51 }
0x134a   :  { %2373 = vrot.lane.b32.xlu0 %v2360_v52, %s2819_s24 }
0x134e   :  { %v2608_v2 = vpop.permute.xlu1 %2607 }
0x13bc   :  { %v2374_v53 = vpop.permute.xlu0 %2373 }
0x13bd   :  { %v2377_v54 = vsel %vm253_vm1, %v2374_v53, 0 }
0x13be   :  { %v2407_v55 = vand.u32 4294901760, %v2377_v54 }
0x13c0   :  { %v2408_v34 = vsub.f32 %v2377_v54, %v2407_v55  ;;  %2457 = vmatmul.f32.gmra.mxu1 %v2407_v55 }
0x13c2   :  { %2492 = vmatmul.f32.gmra.mxu2 %v2408_v34  ;;  %v2409_v56 = vand.u32 4294901760, %v2408_v34 }
0x13c4   :  { %2525 = vmatmul.f32.gmra.mxu3 %v2409_v56  ;;  %v2410_v57 = vsub.f32 %v2408_v34, %v2409_v56 }
0x13c6   :  { %v2411_v58 = vand.u32 4294901760, %v2410_v57 }
0x13c8   :  { %2412 = vmatmul.f32.gmra.mxu0 %v2411_v58  ;;  %2587 = vmatmul.f32.vlgmr.msra.gmra.mxu1 %v2399_v36 }
0x13d0   :  { %2558 = vmatmul.f32.vlgmr.msra.gmra.mxu0 %v2399_v36  ;;  %2591 = vmatmul.f32.gmra.mxu1 %v2407_v55 }
0x13d8   :  { %2562 = vmatmul.f32.gmra.mxu0 %v2407_v55 }
0x143d   :  { %v2458_v6 = vpop.f32.mrf.mxu1 }
0x1445   :  { %v2413_v19 = vpop.f32.mrf.mxu0  ;;  %v2588_v33 = vpop.f32.mrf.mxu1 }
0x1446   :  { %v2414_v8 = vadd.f32 %v2737_v0, %v2413_v19  ;;  %v2493_v1 = vpop.f32.mrf.mxu2 }
0x1447   :  { %v2526_v35 = vpop.f32.mrf.mxu3 }
0x1448   :  { %v2459_v60 = vadd.f32 %v2458_v6, %v2414_v8 }
0x144a   :  { %v2494_v28 = vadd.f32 %v2493_v1, %v2459_v60 }
0x144c   :  { %v2527_v9 = vadd.f32 %v2526_v35, %v2494_v28 }
0x144d   :  { %v2559_v61 = vpop.f32.mrf.mxu0  ;;  %v2592_v14 = vpop.f32.mrf.mxu1 }
0x144e   :  { %v2560_v11 = vadd.f32 %v2559_v61, %v2521_v18 }
0x1450   :  { %v2589_v41 = vadd.f32 %v2588_v33, %v2560_v11 }
0x1452   :  { %v2595_v26 = vmax.f32 %v2589_v41, -20.0 }
0x1454   :  { %v2597_v31 = vmin.f32 %v2595_v26, 2.0 }
0x1455   :  { %v2563_v12 = vpop.f32.mrf.mxu0 }
0x1456   :  { %v2599_v38 = vmul.f32 1.442695, %v2597_v31  ;;  %v2564_v13 = vadd.f32 %v2563_v12, %v2527_v9 }
0x1458   :  { %2802 = vpow2.f32 %v2599_v38  ;;  %v2593_v62 = vadd.f32 %v2592_v14, %v2564_v13 }
0x145a   :  { %v2596_v44 = vmax.f32 %v2593_v62, -20.0 }
0x145c   :  { %v2598_v4 = vmin.f32 %v2596_v44, 2.0 }
0x145e   :  { %v2803_v15 = vpop.eup %2802  ;;  %v2601_v16 = vmul.f32 1.442695, %v2598_v4 }
0x145f   :  { %v2613_v50 = vmul.f32 %v2803_v15, %v2608_v2  ;;  %v2633_v20 = vmul.f32 2.0, %v2803_v15 }
0x1460   :  { %2804 = vpow2.f32 %v2601_v16 }
0x1461   :  { %2617 = vrot.lane.b32.xlu0 %v2613_v50, %s2821_s10  ;;  %v2635_v21 = vmul.f32 %v2803_v15, %v2633_v20 }
0x1463   :  { %2639 = vrot.lane.b32.xlu2 %v2635_v21, %s2821_s10 }
0x1466   :  { %v2805_v24 = vpop.eup %2804 }
0x1467   :  { %v2614_v27 = vmul.f32 %v2805_v24, %v2610_v22  ;;  %v2634_v29 = vmul.f32 2.0, %v2805_v24 }
0x1469   :  { %2619 = vrot.lane.b32.xlu1 %v2614_v27, %s2821_s10  ;;  %v2636_v30 = vmul.f32 %v2805_v24, %v2634_v29 }
0x146b   :  { %2679 = vrot.lane.b32.xlu2 %v2598_v4, %s2821_s10  ;;  %2641 = vrot.lane.b32.xlu0 %v2636_v30, %s2821_s10 }
0x1471   :  { %2677 = vrot.lane.b32.xlu1 %v2597_v31, %s2821_s10 }
0x14bd   :  { %v2640_v32 = vpop.permute.xlu2 %2639 }
0x14be   :  { %2806 = vrcp.f32 %v2640_v32  ;;  %v2656_v39 = vand.u32 2147483648, %v2640_v32  ;;  %vm2650_vm5 = vweird.f32 %v2640_v32  ;;  %v2654_v53 = vand.u32 2147483647, %v2640_v32 }
0x14c0   :  { %v2657_v56 = vor.u32 1.1754944e-38, %v2656_v39  ;;  %vm2655_vm9 = vcmp.eq.f32.partialorder %v2654_v53, 8.507059e+37 }
0x14c4   :  { %v2807_v36 = vpop.eup %2806 }
0x14c5   :  { %v2646_v37 = vmul.f32 %v2807_v36, %v2640_v32  ;;  %vm2651_vm1 = vweird.f32 %v2807_v36  ;;  %v2680_v14 = vpop.permute.xlu2 %2679 }
0x14c6   :  { %vm2652_vm8 = vmor %vm2650_vm5, %vm2651_vm1 }
0x14c7   :  { %v2647_v42 = vsub.f32 1.0, %v2646_v37 }
0x14c9   :  { %v2648_v45 = vmul.f32 %v2807_v36, %v2647_v42 }
0x14cb   :  { %v2649_v51 = vadd.f32 %v2807_v36, %v2648_v45 }
0x14cd   :  { %v2653_v34 = vsel %vm2652_vm8, %v2807_v36, %v2649_v51 }
0x14ce   :  { %v2658_v58 = vsel %vm2655_vm9, %v2657_v56, %v2653_v34 }
0x14d3   :  { %v2618_v40 = vpop.permute.xlu0 %2617 }
0x14d4   :  { %v2623_v43 = vadd.f32 %v2618_v40, %v2589_v41 }
0x14d6   :  { %2808 = vtanh.f32 %v2623_v43  ;;  %v2627_v46 = vsub.f32 %v2623_v43, %v2589_v41 }
0x14d8   :  { %v2629_v48 = vmul.f32 %v2627_v46, %v2627_v46 }
0x14da   :  { %v2631_v55 = vsub.f32 0.0, %v2629_v48 }
0x14db   :  { %v2620_v63 = vpop.permute.xlu1 %2619 }
0x14dc   :  { %v3327_v47 = vpop.eup %2808  ;;  %v2624_v49 = vadd.f32 %v2620_v63, %v2593_v62  ;;  %v2659_v3 = vmul.f32 %v2658_v58, %v2631_v55 }
0x14dd   :  { %v2642_v52 = vpop.permute.xlu0 %2641  ;;  %v2687_v23 = vmul.f32 %v3327_v47, %v3327_v47 }
0x14de   :  { %2810 = vtanh.f32 %v2624_v49  ;;  %v2628_v6 = vsub.f32 %v2624_v49, %v2593_v62  ;;  %v2669_v60 = vand.u32 2147483647, %v2642_v52  ;;  %v2671_v33 = vand.u32 2147483648, %v2642_v52 }
0x14df   :  { %2812 = vrcp.f32 %v2642_v52  ;;  %v2689_v54 = vsub.f32 1.0, %v2687_v23  ;;  %vm2665_vm11 = vweird.f32 %v2642_v52 }
0x14e0   :  { %v2630_v18 = vmul.f32 %v2628_v6, %v2628_v6  ;;  %v2672_v35 = vor.u32 1.1754944e-38, %v2671_v33  ;;  %vm2670_vm13 = vcmp.eq.f32.partialorder %v2669_v60, 8.507059e+37 }
0x14e1   :  { %v2691_v57 = vadd.f32 1e-07, %v2689_v54 }
0x14e2   :  { %v2632_v9 = vsub.f32 0.0, %v2630_v18 }
0x14e3   :  { %2814 = vlog2.f32 %v2691_v57  ;;  %v2678_v59 = vpop.permute.xlu1 %2677 }
0x14e4   :  { %v2811_v0 = vpop.eup %2810  ;;  %v2683_v25 = vsub.f32 %v2659_v3, %v2678_v59 }
0x14e5   :  { %v2813_v5 = vpop.eup %2812  ;;  %v2688_v17 = vmul.f32 %v2811_v0, %v2811_v0 }
0x14e6   :  { %v2661_v19 = vmul.f32 %v2813_v5, %v2642_v52  ;;  %vm2666_vm10 = vweird.f32 %v2813_v5  ;;  %v2725_v28 = vadd.f32 -0.9189385, %v2683_v25 }
0x14e7   :  { %v2690_v10 = vsub.f32 1.0, %v2688_v17  ;;  %vm2667_vm12 = vmor %vm2665_vm11, %vm2666_vm10 }
0x14e8   :  { %v2662_v8 = vsub.f32 1.0, %v2661_v19 }
0x14e9   :  { %v2815_v7 = vpop.eup %2814  ;;  %v2692_v61 = vadd.f32 1e-07, %v2690_v10 }
0x14ea   :  { %v2663_v11 = vmul.f32 %v2813_v5, %v2662_v8  ;;  %v2694_v1 = vmul.f32 0.6931472, %v2815_v7 }
0x14eb   :  { %2816 = vlog2.f32 %v2692_v61 }
0x14ec   :  { %v2664_v41 = vadd.f32 %v2813_v5, %v2663_v11  ;;  %v2697_v26 = vsub.f32 %v2725_v28, %v2694_v1 }
0x14ee   :  { %2701 = vrot.lane.b32.xlu0 %v2697_v26, %s2820_s13  ;;  %v2668_v31 = vsel %vm2667_vm12, %v2813_v5, %v2664_v41 }
0x14ef   :  { %v2673_v12 = vsel %vm2670_vm13, %v2672_v35, %v2668_v31 }
0x14f0   :  { %v2674_v38 = vmul.f32 %v2673_v12, %v2632_v9 }
0x14f1   :  { %v2817_v13 = vpop.eup %2816 }
0x14f2   :  { %v2684_v62 = vsub.f32 %v2674_v38, %v2680_v14  ;;  %v2696_v44 = vmul.f32 0.6931472, %v2817_v13 }
0x14f4   :  { %v2726_v4 = vadd.f32 -0.9189385, %v2684_v62 }
0x14f6   :  { %v2698_v2 = vsub.f32 %v2726_v4, %v2696_v44 }
0x14f8   :  { %2703 = vrot.lane.b32.xlu1 %v2698_v2, %s2820_s13 }
0x1560   :  { %v2702_v15 = vpop.permute.xlu0 %2701 }
0x1561   :  { %v2708_v16 = vsel %vm2707_vm0, %v3327_v47, %v2702_v15 }
0x1562   :  { %2711 = vst.msk [vmem:[%s3351_s11] sm:$0xff] %vm2710_vm2, %v2708_v16 }
0x156a   :  { %v2704_v50 = vpop.permute.xlu1 %2703 }
0x156b   :  { %v2709_v20 = vsel %vm2707_vm0, %v2811_v0, %v2704_v50 }
0x156c   :  { %2712 = vst.msk [vmem:[%s3351_s11 + $0x8] sm:$0xff] %vm2710_vm2, %v2709_v20 }

</bundles_post_ra>
